<compile_context>
chip_gen: v6e
topology: v6e:2x2x1
jax: 0.10.0
libtpu: 0.0.40
codegen_flags: <defaults>
</compile_context>

<pallas_src>
import functools

import jax
import jax.numpy as jnp
from jax.experimental import pallas as pl
from jax.experimental.pallas import tpu as pltpu

LANE = 128


def _round_up(x, m):
    return ((x + m - 1) // m) * m


# ----------------------- fused 3x3 conv + bias + ReLU -----------------------

def _conv3x3_kernel(xa_ref, xb_ref, w_ref, b_ref, o_ref, win_ref, acc_ref,
                    *, TH, W, Cin, Cout, relu):
    # Assemble the (TH+2)-row halo window for this row tile in VMEM scratch.
    win_ref[0:TH] = xa_ref[0]            # rows [r*TH, r*TH+TH) of padded input
    win_ref[TH:TH + 2] = xb_ref[0]       # 2 halo rows [r*TH+TH, r*TH+TH+2)

    acc_ref[...] = jnp.zeros_like(acc_ref)
    for kh in range(3):
        for kw in range(3):
            patch = win_ref[kh:kh + TH, kw:kw + W, :].reshape(TH * W, Cin)
            acc_ref[...] += jnp.dot(patch, w_ref[kh, kw],
                                    preferred_element_type=jnp.float32)

    out = acc_ref[...] + b_ref[...]
    if relu:
        out = jnp.maximum(out, 0.0)
    o_ref[0] = out.reshape(TH, W, Cout)


def _pick_row_tile(H, W, Cp, Cop, budget_bytes=6 * 1024 * 1024):
    """Largest even divisor of H whose per-step working set fits the budget."""
    divs = [d for d in range(2, H + 1, 2) if H % d == 0]
    if not divs:
        return H

    def need(th):
        win = (th + 2) * (W + 2) * Cp          # scratch window
        acc = th * W * Cop                     # scratch accumulator
        xa = 2 * th * (W + 2) * Cp             # double-buffered row tile
        xb = 2 * 2 * (W + 2) * Cp              # double-buffered halo rows
        out = 2 * th * W * Cop                 # double-buffered output tile
        return 4 * (win + acc + xa + xb + out)

    fitting = [d for d in divs if need(d) <= budget_bytes]
    return max(fitting) if fitting else min(divs)


def conv3x3_bias_relu(x_pad, w, b, *, relu=True):
    """Fused 3x3 conv (stride 1) + bias + ReLU.

    x_pad: (B, H+2, W+2, Cp) zero-padded NHWC input, Cp a multiple of 128.
    w:     (3, 3, Cp, Cop) HWIO weights (zero-padded channels).
    b:     (Cop,) bias.
    Returns (B, H, W, Cop) float32.
    """
    B, Hp2, Wp2, Cp = x_pad.shape
    H, W = Hp2 - 2, Wp2 - 2
    Cop = w.shape[-1]
    TH = _pick_row_tile(H, W, Cp, Cop)
    n_r = H // TH

    flops = int(2 * B * H * W * 9 * Cp * Cop)
    bytes_acc = int(4 * (B * Hp2 * Wp2 * Cp + 9 * Cp * Cop + Cop
                         + B * H * W * Cop))

    kernel = functools.partial(_conv3x3_kernel, TH=TH, W=W, Cin=Cp, Cout=Cop,
                               relu=relu)
    return pl.pallas_call(
        kernel,
        out_shape=jax.ShapeDtypeStruct((B, H, W, Cop), jnp.float32),
        grid_spec=pltpu.PrefetchScalarGridSpec(
            num_scalar_prefetch=0,
            grid=(B, n_r),
            in_specs=[
                # main row tile: rows [r*TH, r*TH+TH)
                pl.BlockSpec((1, TH, Wp2, Cp), lambda bb, r: (bb, r, 0, 0)),
                # 2 halo rows: rows [r*TH+TH, r*TH+TH+2)  (TH is even)
                pl.BlockSpec((1, 2, Wp2, Cp),
                             lambda bb, r: (bb, (r + 1) * (TH // 2), 0, 0)),
                pl.BlockSpec((3, 3, Cp, Cop), lambda bb, r: (0, 0, 0, 0)),
                pl.BlockSpec((1, Cop), lambda bb, r: (0, 0)),
            ],
            out_specs=pl.BlockSpec((1, TH, W, Cop), lambda bb, r: (bb, r, 0, 0)),
            scratch_shapes=[
                pltpu.VMEM((TH + 2, Wp2, Cp), jnp.float32),   # halo window
                pltpu.VMEM((TH * W, Cop), jnp.float32),       # accumulator
            ],
        ),
        compiler_params=pltpu.CompilerParams(
            dimension_semantics=("parallel", "parallel"),
            vmem_limit_bytes=48 * 1024 * 1024,
        ),
        cost_estimate=pl.CostEstimate(flops=flops, transcendentals=0,
                                      bytes_accessed=bytes_acc),
    )(x_pad, x_pad, w, b.reshape(1, Cop))


# --------------------- prologue: bilinear 2x + concat -----------------------

def _bilinear_matrix(out_size, in_size):
    """Interpolation matrix (out_size, in_size) for align_corners=True bilinear."""
    if in_size == 1:
        return jnp.ones((out_size, 1), jnp.float32)
    src = jnp.arange(out_size, dtype=jnp.float32) * (in_size - 1) / (out_size - 1)
    i0 = jnp.clip(jnp.floor(src).astype(jnp.int32), 0, in_size - 2)
    f = src - i0.astype(jnp.float32)
    return (jax.nn.one_hot(i0, in_size, dtype=jnp.float32) * (1.0 - f)[:, None]
            + jax.nn.one_hot(i0 + 1, in_size, dtype=jnp.float32) * f[:, None])


# ------------------------------ forward pass --------------------------------

def unet_up_forward(inputs1_nchw, inputs2_nchw, params, out_size):
    x1 = jnp.transpose(inputs1_nchw, (0, 2, 3, 1)).astype(jnp.float32)  # (B,H,W,C1)
    x2 = jnp.transpose(inputs2_nchw, (0, 2, 3, 1)).astype(jnp.float32)  # (B,h,w,C2)
    B, H, W, C1 = x1.shape
    _, h, w, C2 = x2.shape
    assert H % 2 == 0 and W % 2 == 0

    # Gather-free bilinear 2x upsample (align_corners=True) as two small matmuls.
    Uh = _bilinear_matrix(H, h)
    Uw = _bilinear_matrix(W, w)
    up2 = jnp.einsum('Hh,bhwc->bHwc', Uh, x2)
    up2 = jnp.einsum('Ww,bhwc->bhWc', Uw, up2)

    cat = jnp.concatenate([x1, up2], axis=-1)                 # (B, H, W, in_size)
    in_size = C1 + C2
    Cp = params['w1'].shape[2]                                # lane-padded in_size

    # zero-pad channels to the lane-padded width and add the conv1 halo ring
    x_pad = jnp.pad(cat, ((0, 0), (1, 1), (1, 1), (0, Cp - in_size)))

    y1 = conv3x3_bias_relu(x_pad, params['w1'], params['b1'])       # relu(conv1)
    y1_pad = jnp.pad(y1, ((0, 0), (1, 1), (1, 1), (0, 0)))          # conv2 halo
    y2 = conv3x3_bias_relu(y1_pad, params['w2'], params['b2'])      # relu(conv2)

    return jnp.transpose(y2[..., :out_size], (0, 3, 1, 2))          # back to NCHW


# ---------------------------- parameter setup --------------------------------

def init_params(key, in_size, out_size):
    Cp = _round_up(in_size, LANE)
    Cop = _round_up(out_size, LANE)
    k1, k2, k3, k4 = jax.random.split(key, 4)

    def conv_init(k, cin, cout, cin_pad, cout_pad):
        bound = 1.0 / float((cin * 9) ** 0.5)
        wgt = jax.random.uniform(k, (3, 3, cin, cout), jnp.float32, -bound, bound)
        # zero-pad extra channels -> padded lanes carry exact zeros
        return jnp.pad(wgt, ((0, 0), (0, 0),
                             (0, cin_pad - cin), (0, cout_pad - cout)))

    b1 = jnp.pad(jax.random.uniform(k2, (out_size,), jnp.float32, -0.05, 0.05),
                 (0, Cop - out_size))
    b2 = jnp.pad(jax.random.uniform(k4, (out_size,), jnp.float32, -0.05, 0.05),
                 (0, Cop - out_size))
    return {
        'w1': conv_init(k1, in_size, out_size, Cp, Cop),
        'b1': b1,
        'w2': conv_init(k3, out_size, out_size, Cop, Cop),
        'b2': b2,
    }


if __name__ == "__main__":
    key = jax.random.PRNGKey(0)
    k1, k2, kp = jax.random.split(key, 3)

    B, H, W = 2, 16, 16
    C1, C2 = 12, 20                    # skip-connection channels + upsampled channels
    in_size, out_size = C1 + C2, 16

    inputs1 = jax.random.normal(k1, (B, C1, H, W), jnp.float32)           # NCHW
    inputs2 = jax.random.normal(k2, (B, C2, H // 2, W // 2), jnp.float32) # NCHW
    params = init_params(kp, in_size, out_size)

    fwd = jax.jit(unet_up_forward, static_argnames=('out_size',))
    out = fwd(inputs1, inputs2, params, out_size=out_size)
    jax.block_until_ready(out)
    assert out.shape == (B, out_size, H, W) and out.dtype == jnp.float32
    print("KERNEL_OK")
</pallas_src>

<mosaic_0001>
module attributes {stable_mosaic.version = 11 : i64} {
  func.func @_conv3x3_kernel(%arg0: i32, %arg1: i32, %arg2: memref<1x16x18x128xf32, #tpu.memory_space<vmem>>, %arg3: memref<1x2x18x128xf32, #tpu.memory_space<vmem>>, %arg4: memref<3x3x128x128xf32, #tpu.memory_space<vmem>>, %arg5: memref<1x128xf32, #tpu.memory_space<vmem>>, %arg6: memref<1x16x16x128xf32, #tpu.memory_space<vmem>>, %arg7: memref<18x18x128xf32, #tpu.memory_space<vmem>>, %arg8: memref<256x128xf32, #tpu.memory_space<vmem>>) attributes {dimension_semantics = [#tpu.dimension_semantics<parallel>, #tpu.dimension_semantics<parallel>], iteration_bounds = array<i64: 2, 1>, scalar_prefetch = 0 : i64, scratch_operands = 2 : i64, tpu.core_type = #tpu.core_type<tc>, window_params = [{transform_indices = @transform_0, window_bounds = array<i64: 1, 16, 18, 128>}, {transform_indices = @transform_1, window_bounds = array<i64: 1, 2, 18, 128>}, {pipeline_mode = #tpu.pipeline_mode<synchronous>, transform_indices = @transform_2, window_bounds = array<i64: 3, 3, 128, 128>}, {pipeline_mode = #tpu.pipeline_mode<synchronous>, transform_indices = @transform_3, window_bounds = array<i64: 1, 128>}, {transform_indices = @transform_4, window_bounds = array<i64: 1, 16, 16, 128>}]} {
    %c0 = arith.constant 0 : index
    %c0_0 = arith.constant 0 : index
    %c0_1 = arith.constant 0 : index
    %c0_2 = arith.constant 0 : index
    %0 = vector.load %arg2[%c0, %c0_0, %c0_1, %c0_2] : memref<1x16x18x128xf32, #tpu.memory_space<vmem>>, vector<1x16x18x128xf32>
    %1 = vector.shape_cast %0 : vector<1x16x18x128xf32> to vector<16x18x128xf32>
    %c0_3 = arith.constant 0 : index
    %c0_4 = arith.constant 0 : index
    %c0_5 = arith.constant 0 : index
    %2 = vector.load %arg7[%c0_3, %c0_4, %c0_5] : memref<18x18x128xf32, #tpu.memory_space<vmem>>, vector<16x18x128xf32>
    tpu.vector_store %arg7[%c0_3, %c0_4, %c0_5], %1 {strides = array<i32>} : memref<18x18x128xf32, #tpu.memory_space<vmem>>, vector<16x18x128xf32>,
    %c0_6 = arith.constant 0 : index
    %c0_7 = arith.constant 0 : index
    %c0_8 = arith.constant 0 : index
    %c0_9 = arith.constant 0 : index
    %3 = vector.load %arg3[%c0_6, %c0_7, %c0_8, %c0_9] : memref<1x2x18x128xf32, #tpu.memory_space<vmem>>, vector<1x2x18x128xf32>
    %4 = vector.shape_cast %3 : vector<1x2x18x128xf32> to vector<2x18x128xf32>
    %c16 = arith.constant 16 : index
    %c0_10 = arith.constant 0 : index
    %c0_11 = arith.constant 0 : index
    %5 = vector.load %arg7[%c16, %c0_10, %c0_11] : memref<18x18x128xf32, #tpu.memory_space<vmem>>, vector<2x18x128xf32>
    tpu.vector_store %arg7[%c16, %c0_10, %c0_11], %4 {strides = array<i32>} : memref<18x18x128xf32, #tpu.memory_space<vmem>>, vector<2x18x128xf32>,
    %cst = arith.constant 0.000000e+00 : f32
    %6 = vector.broadcast %cst : f32 to vector<256x128xf32>
    %c0_12 = arith.constant 0 : index
    %c0_13 = arith.constant 0 : index
    %7 = vector.load %arg8[%c0_12, %c0_13] : memref<256x128xf32, #tpu.memory_space<vmem>>, vector<256x128xf32>
    tpu.vector_store %arg8[%c0_12, %c0_13], %6 {strides = array<i32>} : memref<256x128xf32, #tpu.memory_space<vmem>>, vector<256x128xf32>,
    %c0_14 = arith.constant 0 : index
    %c0_15 = arith.constant 0 : index
    %c0_16 = arith.constant 0 : index
    %8 = vector.load %arg7[%c0_14, %c0_15, %c0_16] : memref<18x18x128xf32, #tpu.memory_space<vmem>>, vector<16x16x128xf32>
    %9 = vector.shape_cast %8 : vector<16x16x128xf32> to vector<256x128xf32>
    %c0_17 = arith.constant 0 : index
    %c0_18 = arith.constant 0 : index
    %10 = vector.load %arg8[%c0_17, %c0_18] : memref<256x128xf32, #tpu.memory_space<vmem>>, vector<256x128xf32>
    %c0_19 = arith.constant 0 : index
    %c0_20 = arith.constant 0 : index
    %c0_21 = arith.constant 0 : index
    %c0_22 = arith.constant 0 : index
    %11 = vector.load %arg4[%c0_19, %c0_20, %c0_21, %c0_22] : memref<3x3x128x128xf32, #tpu.memory_space<vmem>>, vector<1x1x128x128xf32>
    %12 = vector.shape_cast %11 : vector<1x1x128x128xf32> to vector<128x128xf32>
    %cst_23 = arith.constant dense<0.000000e+00> : vector<256x128xf32>
    %13 = tpu.matmul %9, %12, %cst_23 {dimension_numbers = #tpu.dot_dimension_numbers<[1], [0], [0], [1], [0, 0, 1, 1], [], []>} : vector<256x128xf32>, vector<128x128xf32>, vector<256x128xf32> -> vector<256x128xf32>
    %14 = arith.addf %10, %13 : vector<256x128xf32>
    %c0_24 = arith.constant 0 : index
    %c0_25 = arith.constant 0 : index
    %15 = vector.load %arg8[%c0_24, %c0_25] : memref<256x128xf32, #tpu.memory_space<vmem>>, vector<256x128xf32>
    tpu.vector_store %arg8[%c0_24, %c0_25], %14 {strides = array<i32>} : memref<256x128xf32, #tpu.memory_space<vmem>>, vector<256x128xf32>,
    %c0_26 = arith.constant 0 : index
    %c1 = arith.constant 1 : index
    %c0_27 = arith.constant 0 : index
    %16 = vector.load %arg7[%c0_26, %c1, %c0_27] : memref<18x18x128xf32, #tpu.memory_space<vmem>>, vector<16x16x128xf32>
    %17 = vector.shape_cast %16 : vector<16x16x128xf32> to vector<256x128xf32>
    %c0_28 = arith.constant 0 : index
    %c0_29 = arith.constant 0 : index
    %18 = vector.load %arg8[%c0_28, %c0_29] : memref<256x128xf32, #tpu.memory_space<vmem>>, vector<256x128xf32>
    %c0_30 = arith.constant 0 : index
    %c1_31 = arith.constant 1 : index
    %c0_32 = arith.constant 0 : index
    %c0_33 = arith.constant 0 : index
    %19 = vector.load %arg4[%c0_30, %c1_31, %c0_32, %c0_33] : memref<3x3x128x128xf32, #tpu.memory_space<vmem>>, vector<1x1x128x128xf32>
    %20 = vector.shape_cast %19 : vector<1x1x128x128xf32> to vector<128x128xf32>
    %cst_34 = arith.constant dense<0.000000e+00> : vector<256x128xf32>
    %21 = tpu.matmul %17, %20, %cst_34 {dimension_numbers = #tpu.dot_dimension_numbers<[1], [0], [0], [1], [0, 0, 1, 1], [], []>} : vector<256x128xf32>, vector<128x128xf32>, vector<256x128xf32> -> vector<256x128xf32>
    %22 = arith.addf %18, %21 : vector<256x128xf32>
    %c0_35 = arith.constant 0 : index
    %c0_36 = arith.constant 0 : index
    %23 = vector.load %arg8[%c0_35, %c0_36] : memref<256x128xf32, #tpu.memory_space<vmem>>, vector<256x128xf32>
    tpu.vector_store %arg8[%c0_35, %c0_36], %22 {strides = array<i32>} : memref<256x128xf32, #tpu.memory_space<vmem>>, vector<256x128xf32>,
    %c0_37 = arith.constant 0 : index
    %c2 = arith.constant 2 : index
    %c0_38 = arith.constant 0 : index
    %24 = vector.load %arg7[%c0_37, %c2, %c0_38] : memref<18x18x128xf32, #tpu.memory_space<vmem>>, vector<16x16x128xf32>
    %25 = vector.shape_cast %24 : vector<16x16x128xf32> to vector<256x128xf32>
    %c0_39 = arith.constant 0 : index
    %c0_40 = arith.constant 0 : index
    %26 = vector.load %arg8[%c0_39, %c0_40] : memref<256x128xf32, #tpu.memory_space<vmem>>, vector<256x128xf32>
    %c0_41 = arith.constant 0 : index
    %c2_42 = arith.constant 2 : index
    %c0_43 = arith.constant 0 : index
    %c0_44 = arith.constant 0 : index
    %27 = vector.load %arg4[%c0_41, %c2_42, %c0_43, %c0_44] : memref<3x3x128x128xf32, #tpu.memory_space<vmem>>, vector<1x1x128x128xf32>
    %28 = vector.shape_cast %27 : vector<1x1x128x128xf32> to vector<128x128xf32>
    %cst_45 = arith.constant dense<0.000000e+00> : vector<256x128xf32>
    %29 = tpu.matmul %25, %28, %cst_45 {dimension_numbers = #tpu.dot_dimension_numbers<[1], [0], [0], [1], [0, 0, 1, 1], [], []>} : vector<256x128xf32>, vector<128x128xf32>, vector<256x128xf32> -> vector<256x128xf32>
    %30 = arith.addf %26, %29 : vector<256x128xf32>
    %c0_46 = arith.constant 0 : index
    %c0_47 = arith.constant 0 : index
    %31 = vector.load %arg8[%c0_46, %c0_47] : memref<256x128xf32, #tpu.memory_space<vmem>>, vector<256x128xf32>
    tpu.vector_store %arg8[%c0_46, %c0_47], %30 {strides = array<i32>} : memref<256x128xf32, #tpu.memory_space<vmem>>, vector<256x128xf32>,
    %c1_48 = arith.constant 1 : index
    %c0_49 = arith.constant 0 : index
    %c0_50 = arith.constant 0 : index
    %32 = vector.load %arg7[%c1_48, %c0_49, %c0_50] : memref<18x18x128xf32, #tpu.memory_space<vmem>>, vector<16x16x128xf32>
    %33 = vector.shape_cast %32 : vector<16x16x128xf32> to vector<256x128xf32>
    %c0_51 = arith.constant 0 : index
    %c0_52 = arith.constant 0 : index
    %34 = vector.load %arg8[%c0_51, %c0_52] : memref<256x128xf32, #tpu.memory_space<vmem>>, vector<256x128xf32>
    %c1_53 = arith.constant 1 : index
    %c0_54 = arith.constant 0 : index
    %c0_55 = arith.constant 0 : index
    %c0_56 = arith.constant 0 : index
    %35 = vector.load %arg4[%c1_53, %c0_54, %c0_55, %c0_56] : memref<3x3x128x128xf32, #tpu.memory_space<vmem>>, vector<1x1x128x128xf32>
    %36 = vector.shape_cast %35 : vector<1x1x128x128xf32> to vector<128x128xf32>
    %cst_57 = arith.constant dense<0.000000e+00> : vector<256x128xf32>
    %37 = tpu.matmul %33, %36, %cst_57 {dimension_numbers = #tpu.dot_dimension_numbers<[1], [0], [0], [1], [0, 0, 1, 1], [], []>} : vector<256x128xf32>, vector<128x128xf32>, vector<256x128xf32> -> vector<256x128xf32>
    %38 = arith.addf %34, %37 : vector<256x128xf32>
    %c0_58 = arith.constant 0 : index
    %c0_59 = arith.constant 0 : index
    %39 = vector.load %arg8[%c0_58, %c0_59] : memref<256x128xf32, #tpu.memory_space<vmem>>, vector<256x128xf32>
    tpu.vector_store %arg8[%c0_58, %c0_59], %38 {strides = array<i32>} : memref<256x128xf32, #tpu.memory_space<vmem>>, vector<256x128xf32>,
    %c1_60 = arith.constant 1 : index
    %c1_61 = arith.constant 1 : index
    %c0_62 = arith.constant 0 : index
    %40 = vector.load %arg7[%c1_60, %c1_61, %c0_62] : memref<18x18x128xf32, #tpu.memory_space<vmem>>, vector<16x16x128xf32>
    %41 = vector.shape_cast %40 : vector<16x16x128xf32> to vector<256x128xf32>
    %c0_63 = arith.constant 0 : index
    %c0_64 = arith.constant 0 : index
    %42 = vector.load %arg8[%c0_63, %c0_64] : memref<256x128xf32, #tpu.memory_space<vmem>>, vector<256x128xf32>
    %c1_65 = arith.constant 1 : index
    %c1_66 = arith.constant 1 : index
    %c0_67 = arith.constant 0 : index
    %c0_68 = arith.constant 0 : index
    %43 = vector.load %arg4[%c1_65, %c1_66, %c0_67, %c0_68] : memref<3x3x128x128xf32, #tpu.memory_space<vmem>>, vector<1x1x128x128xf32>
    %44 = vector.shape_cast %43 : vector<1x1x128x128xf32> to vector<128x128xf32>
    %cst_69 = arith.constant dense<0.000000e+00> : vector<256x128xf32>
    %45 = tpu.matmul %41, %44, %cst_69 {dimension_numbers = #tpu.dot_dimension_numbers<[1], [0], [0], [1], [0, 0, 1, 1], [], []>} : vector<256x128xf32>, vector<128x128xf32>, vector<256x128xf32> -> vector<256x128xf32>
    %46 = arith.addf %42, %45 : vector<256x128xf32>
    %c0_70 = arith.constant 0 : index
    %c0_71 = arith.constant 0 : index
    %47 = vector.load %arg8[%c0_70, %c0_71] : memref<256x128xf32, #tpu.memory_space<vmem>>, vector<256x128xf32>
    tpu.vector_store %arg8[%c0_70, %c0_71], %46 {strides = array<i32>} : memref<256x128xf32, #tpu.memory_space<vmem>>, vector<256x128xf32>,
    %c1_72 = arith.constant 1 : index
    %c2_73 = arith.constant 2 : index
    %c0_74 = arith.constant 0 : index
    %48 = vector.load %arg7[%c1_72, %c2_73, %c0_74] : memref<18x18x128xf32, #tpu.memory_space<vmem>>, vector<16x16x128xf32>
    %49 = vector.shape_cast %48 : vector<16x16x128xf32> to vector<256x128xf32>
    %c0_75 = arith.constant 0 : index
    %c0_76 = arith.constant 0 : index
    %50 = vector.load %arg8[%c0_75, %c0_76] : memref<256x128xf32, #tpu.memory_space<vmem>>, vector<256x128xf32>
    %c1_77 = arith.constant 1 : index
    %c2_78 = arith.constant 2 : index
    %c0_79 = arith.constant 0 : index
    %c0_80 = arith.constant 0 : index
    %51 = vector.load %arg4[%c1_77, %c2_78, %c0_79, %c0_80] : memref<3x3x128x128xf32, #tpu.memory_space<vmem>>, vector<1x1x128x128xf32>
    %52 = vector.shape_cast %51 : vector<1x1x128x128xf32> to vector<128x128xf32>
    %cst_81 = arith.constant dense<0.000000e+00> : vector<256x128xf32>
    %53 = tpu.matmul %49, %52, %cst_81 {dimension_numbers = #tpu.dot_dimension_numbers<[1], [0], [0], [1], [0, 0, 1, 1], [], []>} : vector<256x128xf32>, vector<128x128xf32>, vector<256x128xf32> -> vector<256x128xf32>
    %54 = arith.addf %50, %53 : vector<256x128xf32>
    %c0_82 = arith.constant 0 : index
    %c0_83 = arith.constant 0 : index
    %55 = vector.load %arg8[%c0_82, %c0_83] : memref<256x128xf32, #tpu.memory_space<vmem>>, vector<256x128xf32>
    tpu.vector_store %arg8[%c0_82, %c0_83], %54 {strides = array<i32>} : memref<256x128xf32, #tpu.memory_space<vmem>>, vector<256x128xf32>,
    %c2_84 = arith.constant 2 : index
    %c0_85 = arith.constant 0 : index
    %c0_86 = arith.constant 0 : index
    %56 = vector.load %arg7[%c2_84, %c0_85, %c0_86] : memref<18x18x128xf32, #tpu.memory_space<vmem>>, vector<16x16x128xf32>
    %57 = vector.shape_cast %56 : vector<16x16x128xf32> to vector<256x128xf32>
    %c0_87 = arith.constant 0 : index
    %c0_88 = arith.constant 0 : index
    %58 = vector.load %arg8[%c0_87, %c0_88] : memref<256x128xf32, #tpu.memory_space<vmem>>, vector<256x128xf32>
    %c2_89 = arith.constant 2 : index
    %c0_90 = arith.constant 0 : index
    %c0_91 = arith.constant 0 : index
    %c0_92 = arith.constant 0 : index
    %59 = vector.load %arg4[%c2_89, %c0_90, %c0_91, %c0_92] : memref<3x3x128x128xf32, #tpu.memory_space<vmem>>, vector<1x1x128x128xf32>
    %60 = vector.shape_cast %59 : vector<1x1x128x128xf32> to vector<128x128xf32>
    %cst_93 = arith.constant dense<0.000000e+00> : vector<256x128xf32>
    %61 = tpu.matmul %57, %60, %cst_93 {dimension_numbers = #tpu.dot_dimension_numbers<[1], [0], [0], [1], [0, 0, 1, 1], [], []>} : vector<256x128xf32>, vector<128x128xf32>, vector<256x128xf32> -> vector<256x128xf32>
    %62 = arith.addf %58, %61 : vector<256x128xf32>
    %c0_94 = arith.constant 0 : index
    %c0_95 = arith.constant 0 : index
    %63 = vector.load %arg8[%c0_94, %c0_95] : memref<256x128xf32, #tpu.memory_space<vmem>>, vector<256x128xf32>
    tpu.vector_store %arg8[%c0_94, %c0_95], %62 {strides = array<i32>} : memref<256x128xf32, #tpu.memory_space<vmem>>, vector<256x128xf32>,
    %c2_96 = arith.constant 2 : index
    %c1_97 = arith.constant 1 : index
    %c0_98 = arith.constant 0 : index
    %64 = vector.load %arg7[%c2_96, %c1_97, %c0_98] : memref<18x18x128xf32, #tpu.memory_space<vmem>>, vector<16x16x128xf32>
    %65 = vector.shape_cast %64 : vector<16x16x128xf32> to vector<256x128xf32>
    %c0_99 = arith.constant 0 : index
    %c0_100 = arith.constant 0 : index
    %66 = vector.load %arg8[%c0_99, %c0_100] : memref<256x128xf32, #tpu.memory_space<vmem>>, vector<256x128xf32>
    %c2_101 = arith.constant 2 : index
    %c1_102 = arith.constant 1 : index
    %c0_103 = arith.constant 0 : index
    %c0_104 = arith.constant 0 : index
    %67 = vector.load %arg4[%c2_101, %c1_102, %c0_103, %c0_104] : memref<3x3x128x128xf32, #tpu.memory_space<vmem>>, vector<1x1x128x128xf32>
    %68 = vector.shape_cast %67 : vector<1x1x128x128xf32> to vector<128x128xf32>
    %cst_105 = arith.constant dense<0.000000e+00> : vector<256x128xf32>
    %69 = tpu.matmul %65, %68, %cst_105 {dimension_numbers = #tpu.dot_dimension_numbers<[1], [0], [0], [1], [0, 0, 1, 1], [], []>} : vector<256x128xf32>, vector<128x128xf32>, vector<256x128xf32> -> vector<256x128xf32>
    %70 = arith.addf %66, %69 : vector<256x128xf32>
    %c0_106 = arith.constant 0 : index
    %c0_107 = arith.constant 0 : index
    %71 = vector.load %arg8[%c0_106, %c0_107] : memref<256x128xf32, #tpu.memory_space<vmem>>, vector<256x128xf32>
    tpu.vector_store %arg8[%c0_106, %c0_107], %70 {strides = array<i32>} : memref<256x128xf32, #tpu.memory_space<vmem>>, vector<256x128xf32>,
    %c2_108 = arith.constant 2 : index
    %c2_109 = arith.constant 2 : index
    %c0_110 = arith.constant 0 : index
    %72 = vector.load %arg7[%c2_108, %c2_109, %c0_110] : memref<18x18x128xf32, #tpu.memory_space<vmem>>, vector<16x16x128xf32>
    %73 = vector.shape_cast %72 : vector<16x16x128xf32> to vector<256x128xf32>
    %c0_111 = arith.constant 0 : index
    %c0_112 = arith.constant 0 : index
    %74 = vector.load %arg8[%c0_111, %c0_112] : memref<256x128xf32, #tpu.memory_space<vmem>>, vector<256x128xf32>
    %c2_113 = arith.constant 2 : index
    %c2_114 = arith.constant 2 : index
    %c0_115 = arith.constant 0 : index
    %c0_116 = arith.constant 0 : index
    %75 = vector.load %arg4[%c2_113, %c2_114, %c0_115, %c0_116] : memref<3x3x128x128xf32, #tpu.memory_space<vmem>>, vector<1x1x128x128xf32>
    %76 = vector.shape_cast %75 : vector<1x1x128x128xf32> to vector<128x128xf32>
    %cst_117 = arith.constant dense<0.000000e+00> : vector<256x128xf32>
    %77 = tpu.matmul %73, %76, %cst_117 {dimension_numbers = #tpu.dot_dimension_numbers<[1], [0], [0], [1], [0, 0, 1, 1], [], []>} : vector<256x128xf32>, vector<128x128xf32>, vector<256x128xf32> -> vector<256x128xf32>
    %78 = arith.addf %74, %77 : vector<256x128xf32>
    %c0_118 = arith.constant 0 : index
    %c0_119 = arith.constant 0 : index
    %79 = vector.load %arg8[%c0_118, %c0_119] : memref<256x128xf32, #tpu.memory_space<vmem>>, vector<256x128xf32>
    tpu.vector_store %arg8[%c0_118, %c0_119], %78 {strides = array<i32>} : memref<256x128xf32, #tpu.memory_space<vmem>>, vector<256x128xf32>,
    %c0_120 = arith.constant 0 : index
    %c0_121 = arith.constant 0 : index
    %80 = vector.load %arg8[%c0_120, %c0_121] : memref<256x128xf32, #tpu.memory_space<vmem>>, vector<256x128xf32>
    %c0_122 = arith.constant 0 : index
    %c0_123 = arith.constant 0 : index
    %81 = vector.load %arg5[%c0_122, %c0_123] : memref<1x128xf32, #tpu.memory_space<vmem>>, vector<1x128xf32>
    %82 = vector.broadcast %81 : vector<1x128xf32> to vector<256x128xf32>
    %83 = arith.addf %80, %82 : vector<256x128xf32>
    %cst_124 = arith.constant 0.000000e+00 : f32
    %84 = vector.broadcast %cst_124 : f32 to vector<256x128xf32>
    %85 = arith.maximumf %83, %84 : vector<256x128xf32>
    %86 = vector.shape_cast %85 : vector<256x128xf32> to vector<16x16x128xf32>
    %c0_125 = arith.constant 0 : index
    %c0_126 = arith.constant 0 : index
    %c0_127 = arith.constant 0 : index
    %c0_128 = arith.constant 0 : index
    %87 = vector.load %arg6[%c0_125, %c0_126, %c0_127, %c0_128] : memref<1x16x16x128xf32, #tpu.memory_space<vmem>>, vector<1x16x16x128xf32>
    %88 = vector.shape_cast %87 : vector<1x16x16x128xf32> to vector<16x16x128xf32>
    %89 = vector.shape_cast %86 : vector<16x16x128xf32> to vector<1x16x16x128xf32>
    tpu.vector_store %arg6[%c0_125, %c0_126, %c0_127, %c0_128], %89 {strides = array<i32>} : memref<1x16x16x128xf32, #tpu.memory_space<vmem>>, vector<1x16x16x128xf32>,
    return
  }
  func.func @transform_0(%arg0: i32, %arg1: i32) -> (i32, i32, i32, i32) {
    %c0_i32 = arith.constant 0 : i32
    %c0_i32_0 = arith.constant 0 : i32
    %c0_i32_1 = arith.constant 0 : i32
    return %arg0, %arg1, %c0_i32, %c0_i32_0 : i32, i32, i32, i32
  }
  func.func @transform_1(%arg0: i32, %arg1: i32) -> (i32, i32, i32, i32) {
    %c1_i32 = arith.constant 1 : i32
    %0 = arith.addi %arg1, %c1_i32 : i32
    %c8_i32 = arith.constant 8 : i32
    %1 = arith.muli %0, %c8_i32 : i32
    %c0_i32 = arith.constant 0 : i32
    %c0_i32_0 = arith.constant 0 : i32
    %c0_i32_1 = arith.constant 0 : i32
    return %arg0, %1, %c0_i32, %c0_i32_0 : i32, i32, i32, i32
  }
  func.func @transform_2(%arg0: i32, %arg1: i32) -> (i32, i32, i32, i32) {
    %c0_i32 = arith.constant 0 : i32
    %c0_i32_0 = arith.constant 0 : i32
    %c0_i32_1 = arith.constant 0 : i32
    %c0_i32_2 = arith.constant 0 : i32
    %c0_i32_3 = arith.constant 0 : i32
    return %c0_i32, %c0_i32_0, %c0_i32_1, %c0_i32_2 : i32, i32, i32, i32
  }
  func.func @transform_3(%arg0: i32, %arg1: i32) -> (i32, i32) {
    %c0_i32 = arith.constant 0 : i32
    %c0_i32_0 = arith.constant 0 : i32
    %c0_i32_1 = arith.constant 0 : i32
    return %c0_i32, %c0_i32_0 : i32, i32
  }
  func.func @transform_4(%arg0: i32, %arg1: i32) -> (i32, i32, i32, i32) {
    %c0_i32 = arith.constant 0 : i32
    %c0_i32_0 = arith.constant 0 : i32
    %c0_i32_1 = arith.constant 0 : i32
    return %arg0, %arg1, %c0_i32, %c0_i32_0 : i32, i32, i32, i32
  }
}

</mosaic_0001>

<bundles_post_ra>
// kernel: unet_up_forward.2
= control target key start
LH: loop header
LB: loop body
LE: loop exit
PB: predicated region body
PF: predicated region fallthrough
CT: control target
= control target key end

     0   :  { %s5455_s15 = smov 0   ;;  %s5457_s16 = smov 0   ;;  %s6985_s0 = inlined_call_operand.vmem [shape: f32[2,18,18,128], index: 0, kind: input, shape index: {}, may-alias: {0,1}]   ;;  %s6986_s1 = inlined_call_operand.vmem [shape: f32[2,18,18,128], index: 1, kind: input, shape index: {}, may-alias: {0,1}]   ;;  %s6987_s2 = inlined_call_operand.vmem [shape: f32[3,3,128,128], index: 2, kind: input, shape index: {}]   ;;  %s6988_s3 = inlined_call_operand.vmem [shape: f32[1,128], index: 3, kind: input, shape index: {}]   ;;  %s6989_s4 = inlined_call_operand.vmem [shape: f32[2,16,16,128], index: 4, kind: output, shape index: {}]  }
   0x1   :  { %s5459_s17 = smov 0  }
   0x2 LB: > { %s26_s18 = sadd.s32 1, %s5424_s16  ;;  %p4048_p0 = scmp.ge.s32.totalorder %s5428_s17, 1  ;;  %s5428_s17 = sphi %s5459_s17, %s14_s17   ;;  %s5424_s16 = sphi %s5457_s16, %s7125_s16   ;;  %s5420_s15 = sphi %s5455_s15, %s7124_s15  }
   0x3   : > { %p28_p1 = scmp.ge.s32.totalorder %s26_s18, 2  ;;  %p220_p2 = scmp.lt.s32.totalorder %s5428_s17, 3 }
   0x5   : > { %s7127_s18 = smov (%p28_p1, %s26_s18), 0  ;;  %p221_p3 = pnand %p4048_p0, %p220_p2 }
   0x7   : > { %224 = sbr.rel (%p221_p3) target bundleno = 549 (0x225), region = 36 }
   0xc   : > { %v540_v0 = vld [vmem:[%s6987_s2 + $0x78] sm:$0xff]  ;;  %v539_v1 = vld [vmem:[%s6987_s2 + $0x70] sm:$0xff]  ;;  %p279_p4 = scmp.lt.s32.totalorder %s5420_s15, 1  ;;  %v538_v2 = vld [vmem:[%s6987_s2 + $0x68] sm:$0xff] }
   0xd   : > { %5339 = vmatprep.subr.mxu1 %v540_v0  ;;  %4619 = vmatprep.subr.mxu0 %v540_v0  ;;  %v537_v3 = vld [vmem:[%s6987_s2 + $0x60] sm:$0xff]  ;;  %v536_v4 = vld [vmem:[%s6987_s2 + $0x58] sm:$0xff]  ;;  %v535_v5 = vld [vmem:[%s6987_s2 + $0x50] sm:$0xff] }
   0xe   : > { %5355 = vmatpush3.msra.mxu1 %v540_v0  ;;  %4620 = vmatpush3.msra.mxu0 %v540_v0  ;;  %s7129_s15 = smov (!%p279_p4, %s5420_s15), 1  ;;  %v534_v14 = vld [vmem:[%s6987_s2 + $0x48] sm:$0xff]  ;;  %v533_v18 = vld [vmem:[%s6987_s2 + $0x40] sm:$0xff]  ;;  %v532_v22 = vld [vmem:[%s6987_s2 + $0x38] sm:$0xff] }
   0xf   : > { %5340 = vmatprep.subr.mxu1 %v539_v1  ;;  %4621 = vmatprep.subr.mxu0 %v539_v1  ;;  %s5371_s27 = smul.u32 432, %s7129_s15  ;;  %v531_v26 = vld [vmem:[%s6987_s2 + $0x30] sm:$0xff]  ;;  %v530_v30 = vld [vmem:[%s6987_s2 + $0x28] sm:$0xff]  ;;  %v529_v34 = vld [vmem:[%s6987_s2 + $0x20] sm:$0xff]  ;;  %s4186_s19 = sshll.u32 %s7129_s15, 8 }
  0x10   : > { %5356 = vmatpush3.msra.mxu1 %v539_v1  ;;  %4622 = vmatpush3.msra.mxu0 %v539_v1  ;;  %v528_v38 = vld [vmem:[%s6987_s2 + $0x18] sm:$0xff]  ;;  %v527_v42 = vld [vmem:[%s6987_s2 + $0x10] sm:$0xff]  ;;  %v526_v46 = vld [vmem:[%s6987_s2 + $0x8] sm:$0xff]  ;;  %s6834_s21 = scalar_lea.vmem %s6989_s4, %s4186_s19 }
  0x11   : > { %5341 = vmatprep.subr.mxu1 %v538_v2  ;;  %4623 = vmatprep.subr.mxu0 %v538_v2  ;;  %s5499_s8 = scalar_lea.vmem %s6985_s0, %s5371_s27  ;;  %v525_v48 = vld [vmem:[%s6987_s2] sm:$0xff]  ;;  %v4068_v51 = vld [vmem:[%s6987_s2 + $0xf8] sm:$0xff]  ;;  %v4067_v54 = vld [vmem:[%s6987_s2 + $0xf0] sm:$0xff]  ;;  %s4185_s29 = sadd.s32 384, %s5371_s27 }
  0x12   : > { %5357 = vmatpush3.msra.mxu1 %v538_v2  ;;  %4624 = vmatpush3.msra.mxu0 %v538_v2  ;;  %v5502_v6 = vld [vmem:[%s5499_s8 + $0xc0] sm:$0xff]  ;;  %v5508_v8 = vld [vmem:[%s5499_s8 + $0xc8] sm:$0xff]  ;;  %v5517_v10 = vld [vmem:[%s5499_s8 + $0xd8] sm:$0xff]  ;;  %s5796_s9 = scalar_lea.vmem %s6986_s1, %s4185_s29 }
  0x13   : > { %5342 = vmatprep.subr.mxu1 %v537_v3  ;;  %4625 = vmatprep.subr.mxu0 %v537_v3  ;;  %v5505_v7 = vld [vmem:[%s5499_s8] sm:$0xff]  ;;  %392 = vst [vmem:[#allocation2 + $0xc0] sm:$0xff] %v5502_v6  ;;  %393 = vst [vmem:[#allocation2 + $0xc8] sm:$0xff] %v5508_v8  ;;  %v5514_v9 = vld [vmem:[%s5499_s8 + $0x8] sm:$0xff] }
  0x14   : > { %5358 = vmatpush3.msra.mxu1 %v537_v3  ;;  %4626 = vmatpush3.msra.mxu0 %v537_v3  ;;  %368 = vst [vmem:[#allocation2] sm:$0xff] %v5505_v7  ;;  %v5520_v11 = vld [vmem:[%s5499_s8 + $0x18] sm:$0xff]  ;;  %369 = vst [vmem:[#allocation2 + $0x8] sm:$0xff] %v5514_v9  ;;  %v5526_v12 = vld [vmem:[%s5499_s8 + $0xe0] sm:$0xff] }
  0x15   : > { %5343 = vmatprep.subr.mxu1 %v536_v4  ;;  %4627 = vmatprep.subr.mxu0 %v536_v4  ;;  %395 = vst [vmem:[#allocation2 + $0xd8] sm:$0xff] %v5517_v10  ;;  %371 = vst [vmem:[#allocation2 + $0x18] sm:$0xff] %v5520_v11  ;;  %v5529_v13 = vld [vmem:[%s5499_s8 + $0x20] sm:$0xff]  ;;  %v5537_v15 = vld [vmem:[%s5499_s8 + $0xf0] sm:$0xff] }
  0x16   : > { %5359 = vmatpush3.msra.mxu1 %v536_v4  ;;  %4628 = vmatpush3.msra.mxu0 %v536_v4  ;;  %396 = vst [vmem:[#allocation2 + $0xe0] sm:$0xff] %v5526_v12  ;;  %372 = vst [vmem:[#allocation2 + $0x20] sm:$0xff] %v5529_v13  ;;  %v5541_v16 = vld [vmem:[%s5499_s8 + $0x30] sm:$0xff]  ;;  %v5544_v17 = vld [vmem:[%s5499_s8 + $0xf8] sm:$0xff] }
  0x17   : > { %5344 = vmatprep.subr.mxu1 %v535_v5  ;;  %4629 = vmatprep.subr.mxu0 %v535_v5  ;;  %398 = vst [vmem:[#allocation2 + $0xf0] sm:$0xff] %v5537_v15  ;;  %374 = vst [vmem:[#allocation2 + $0x30] sm:$0xff] %v5541_v16  ;;  %v5552_v19 = vld [vmem:[%s5499_s8 + $0x38] sm:$0xff]  ;;  %v5556_v20 = vld [vmem:[%s5499_s8 + $0x108] sm:$0xff] }
  0x18   : > { %5360 = vmatpush3.msra.mxu1 %v535_v5  ;;  %4630 = vmatpush3.msra.mxu0 %v535_v5  ;;  %399 = vst [vmem:[#allocation2 + $0xf8] sm:$0xff] %v5544_v17  ;;  %375 = vst [vmem:[#allocation2 + $0x38] sm:$0xff] %v5552_v19  ;;  %v5559_v21 = vld [vmem:[%s5499_s8 + $0x48] sm:$0xff]  ;;  %v5567_v23 = vld [vmem:[%s5499_s8 + $0x110] sm:$0xff] }
  0x19   : > { %5345 = vmatprep.subr.mxu1 %v534_v14  ;;  %4631 = vmatprep.subr.mxu0 %v534_v14  ;;  %401 = vst [vmem:[#allocation2 + $0x108] sm:$0xff] %v5556_v20  ;;  %377 = vst [vmem:[#allocation2 + $0x48] sm:$0xff] %v5559_v21  ;;  %v5570_v24 = vld [vmem:[%s5499_s8 + $0x50] sm:$0xff]  ;;  %v5575_v25 = vld [vmem:[%s5499_s8 + $0x120] sm:$0xff] }
  0x1a   : > { %5361 = vmatpush3.msra.mxu1 %v534_v14  ;;  %4632 = vmatpush3.msra.mxu0 %v534_v14  ;;  %402 = vst [vmem:[#allocation2 + $0x110] sm:$0xff] %v5567_v23  ;;  %378 = vst [vmem:[#allocation2 + $0x50] sm:$0xff] %v5570_v24  ;;  %v5582_v27 = vld [vmem:[%s5499_s8 + $0x60] sm:$0xff]  ;;  %v5585_v28 = vld [vmem:[%s5499_s8 + $0x128] sm:$0xff] }
  0x1b   : > { %5346 = vmatprep.subr.mxu1 %v533_v18  ;;  %4633 = vmatprep.subr.mxu0 %v533_v18  ;;  %404 = vst [vmem:[#allocation2 + $0x120] sm:$0xff] %v5575_v25  ;;  %380 = vst [vmem:[#allocation2 + $0x60] sm:$0xff] %v5582_v27  ;;  %v5590_v29 = vld [vmem:[%s5499_s8 + $0x68] sm:$0xff]  ;;  %v5597_v31 = vld [vmem:[%s5499_s8 + $0x138] sm:$0xff] }
  0x1c   : > { %5362 = vmatpush3.msra.mxu1 %v533_v18  ;;  %4634 = vmatpush3.msra.mxu0 %v533_v18  ;;  %405 = vst [vmem:[#allocation2 + $0x128] sm:$0xff] %v5585_v28  ;;  %381 = vst [vmem:[#allocation2 + $0x68] sm:$0xff] %v5590_v29  ;;  %v5601_v32 = vld [vmem:[%s5499_s8 + $0x78] sm:$0xff]  ;;  %v5604_v33 = vld [vmem:[%s5499_s8 + $0x140] sm:$0xff] }
  0x1d   : > { %5347 = vmatprep.subr.mxu1 %v532_v22  ;;  %4635 = vmatprep.subr.mxu0 %v532_v22  ;;  %407 = vst [vmem:[#allocation2 + $0x138] sm:$0xff] %v5597_v31  ;;  %383 = vst [vmem:[#allocation2 + $0x78] sm:$0xff] %v5601_v32  ;;  %v5612_v35 = vld [vmem:[%s5499_s8 + $0x80] sm:$0xff]  ;;  %v5616_v36 = vld [vmem:[%s5499_s8 + $0x150] sm:$0xff] }
  0x1e   : > { %5363 = vmatpush3.msra.mxu1 %v532_v22  ;;  %4636 = vmatpush3.msra.mxu0 %v532_v22  ;;  %408 = vst [vmem:[#allocation2 + $0x140] sm:$0xff] %v5604_v33  ;;  %384 = vst [vmem:[#allocation2 + $0x80] sm:$0xff] %v5612_v35  ;;  %v5619_v37 = vld [vmem:[%s5499_s8 + $0x90] sm:$0xff]  ;;  %v5627_v39 = vld [vmem:[%s5499_s8 + $0x158] sm:$0xff] }
  0x1f   : > { %5348 = vmatprep.subr.mxu1 %v531_v26  ;;  %4637 = vmatprep.subr.mxu0 %v531_v26  ;;  %410 = vst [vmem:[#allocation2 + $0x150] sm:$0xff] %v5616_v36  ;;  %386 = vst [vmem:[#allocation2 + $0x90] sm:$0xff] %v5619_v37  ;;  %v5630_v40 = vld [vmem:[%s5499_s8 + $0x98] sm:$0xff]  ;;  %v5635_v41 = vld [vmem:[%s5499_s8 + $0x168] sm:$0xff] }
  0x20   : > { %5364 = vmatpush3.msra.mxu1 %v531_v26  ;;  %4638 = vmatpush3.msra.mxu0 %v531_v26  ;;  %411 = vst [vmem:[#allocation2 + $0x158] sm:$0xff] %v5627_v39  ;;  %387 = vst [vmem:[#allocation2 + $0x98] sm:$0xff] %v5630_v40  ;;  %v5642_v43 = vld [vmem:[%s5499_s8 + $0xa8] sm:$0xff]  ;;  %v5645_v44 = vld [vmem:[%s5499_s8 + $0x170] sm:$0xff] }
  0x21   : > { %5349 = vmatprep.subr.mxu1 %v530_v30  ;;  %4639 = vmatprep.subr.mxu0 %v530_v30  ;;  %413 = vst [vmem:[#allocation2 + $0x168] sm:$0xff] %v5635_v41  ;;  %389 = vst [vmem:[#allocation2 + $0xa8] sm:$0xff] %v5642_v43  ;;  %v5650_v45 = vld [vmem:[%s5499_s8 + $0xb0] sm:$0xff]  ;;  %v325_v49 = vld [vmem:[%s5499_s8 + $0x28] sm:$0x3] }
  0x22   : > { %5365 = vmatpush3.msra.mxu1 %v530_v30  ;;  %4640 = vmatpush3.msra.mxu0 %v530_v30  ;;  %414 = vst [vmem:[#allocation2 + $0x170] sm:$0xff] %v5645_v44  ;;  %390 = vst [vmem:[#allocation2 + $0xb0] sm:$0xff] %v5650_v45  ;;  %v322_v47 = vld [vmem:[%s5499_s8 + $0x10] sm:$0x3]  ;;  %v328_v50 = vld [vmem:[%s5499_s8 + $0x40] sm:$0x3] }
  0x23   : > { %5350 = vmatprep.subr.mxu1 %v529_v34  ;;  %4641 = vmatprep.subr.mxu0 %v529_v34  ;;  %370 = vst [vmem:[#allocation2 + $0x10] sm:$0x3] %v322_v47  ;;  %373 = vst [vmem:[#allocation2 + $0x28] sm:$0x3] %v325_v49  ;;  %v331_v52 = vld [vmem:[%s5499_s8 + $0x58] sm:$0x3] }
  0x24   : > { %5366 = vmatpush3.msra.mxu1 %v529_v34  ;;  %4642 = vmatpush3.msra.mxu0 %v529_v34  ;;  %376 = vst [vmem:[#allocation2 + $0x40] sm:$0x3] %v328_v50  ;;  %v4084_v53 = vld [vmem:[%s6987_s2 + $0x178] sm:$0xff]  ;;  %379 = vst [vmem:[#allocation2 + $0x58] sm:$0x3] %v331_v52  ;;  %v4083_v56 = vld [vmem:[%s6987_s2 + $0x170] sm:$0xff] }
  0x25   : > { %5351 = vmatprep.subr.mxu1 %v528_v38  ;;  %4643 = vmatprep.subr.mxu0 %v528_v38  ;;  %v334_v55 = vld [vmem:[%s5499_s8 + $0x70] sm:$0x3]  ;;  %v337_v57 = vld [vmem:[%s5499_s8 + $0x88] sm:$0x3]  ;;  %v4065_v60 = vld [vmem:[%s6987_s2 + $0xe0] sm:$0xff] }
  0x26   : > { %5367 = vmatpush3.msra.mxu1 %v528_v38  ;;  %4644 = vmatpush3.msra.mxu0 %v528_v38  ;;  %382 = vst [vmem:[#allocation2 + $0x70] sm:$0x3] %v334_v55  ;;  %v4066_v58 = vld [vmem:[%s6987_s2 + $0xe8] sm:$0xff]  ;;  %385 = vst [vmem:[#allocation2 + $0x88] sm:$0x3] %v337_v57  ;;  %v4081_v62 = vld [vmem:[%s6987_s2 + $0x160] sm:$0xff] }
  0x27   : > { %5352 = vmatprep.subr.mxu1 %v527_v42  ;;  %4645 = vmatprep.subr.mxu0 %v527_v42  ;;  %v4082_v59 = vld [vmem:[%s6987_s2 + $0x168] sm:$0xff]  ;;  %v340_v61 = vld [vmem:[%s5499_s8 + $0xa0] sm:$0x3]  ;;  %v343_v63 = vld [vmem:[%s5499_s8 + $0xb8] sm:$0x3] }
  0x28   : > { %5368 = vmatpush3.msra.mxu1 %v527_v42  ;;  %4646 = vmatpush3.msra.mxu0 %v527_v42  ;;  %388 = vst [vmem:[#allocation2 + $0xa0] sm:$0x3] %v340_v61  ;;  %v4064_v0 = vld [vmem:[%s6987_s2 + $0xd8] sm:$0xff]  ;;  %391 = vst [vmem:[#allocation2 + $0xb8] sm:$0x3] %v343_v63  ;;  %v4063_v3 = vld [vmem:[%s6987_s2 + $0xd0] sm:$0xff] }
  0x29   : > { %5353 = vmatprep.subr.mxu1 %v526_v46  ;;  %4647 = vmatprep.subr.mxu0 %v526_v46  ;;  %v346_v1 = vld [vmem:[%s5499_s8 + $0xd0] sm:$0x3]  ;;  %v4080_v2 = vld [vmem:[%s6987_s2 + $0x158] sm:$0xff]  ;;  %v349_v4 = vld [vmem:[%s5499_s8 + $0xe8] sm:$0x3] }
  0x2a   : > { %5369 = vmatpush3.msra.mxu1 %v526_v46  ;;  %4648 = vmatpush3.msra.mxu0 %v526_v46  ;;  %394 = vst [vmem:[#allocation2 + $0xd0] sm:$0x3] %v346_v1  ;;  %v4079_v5 = vld [vmem:[%s6987_s2 + $0x150] sm:$0xff]  ;;  %397 = vst [vmem:[#allocation2 + $0xe8] sm:$0x3] %v349_v4  ;;  %v4076_v18 = vld [vmem:[%s6987_s2 + $0x138] sm:$0xff] }
  0x2b   : > { %5354 = vmatprep.subr.mxu1 %v525_v48  ;;  %4649 = vmatprep.subr.mxu0 %v525_v48  ;;  %v358_v14 = vld [vmem:[%s5499_s8 + $0x130] sm:$0x3]  ;;  %v364_v22 = vld [vmem:[%s5499_s8 + $0x160] sm:$0x3]  ;;  %v4058_v26 = vld [vmem:[%s6987_s2 + $0xa8] sm:$0xff] }
  0x2c   : > { %5370 = vmatpush3.msra.mxu1 %v525_v48  ;;  %4675 = vmatprep.mubr.f32.mxu1 %v5502_v6  ;;  %v352_v6 = vld [vmem:[%s5499_s8 + $0x100] sm:$0x3]  ;;  %406 = vst [vmem:[#allocation2 + $0x130] sm:$0x3] %v358_v14  ;;  %412 = vst [vmem:[#allocation2 + $0x160] sm:$0x3] %v364_v22 }
  0x2d   : > { %4650 = vmatpush3.msra.mxu0 %v525_v48  ;;  %4651 = vmatprep.mubr.f32.mxu0 %v5505_v7  ;;  %v4062_v7 = vld [vmem:[%s6987_s2 + $0xc8] sm:$0xff]  ;;  %400 = vst [vmem:[#allocation2 + $0x100] sm:$0x3] %v352_v6  ;;  %v4057_v30 = vld [vmem:[%s6987_s2 + $0xa0] sm:$0xff]  ;;  %v4072_v34 = vld [vmem:[%s6987_s2 + $0x118] sm:$0xff] }
  0x2e   : > { %4676 = vmatmul.mubr.f32.vlgmr.msra.gmra.mxu1 %v5508_v8  ;;  %4699 = vmatprep.subr.mxu1 %v4068_v51  ;;  %v355_v8 = vld [vmem:[%s5499_s8 + $0x118] sm:$0x3]  ;;  %v4055_v38 = vld [vmem:[%s6987_s2 + $0x90] sm:$0xff]  ;;  %v4053_v42 = vld [vmem:[%s6987_s2 + $0x80] sm:$0xff] }
  0x2f   : > { %4652 = vmatmul.mubr.f32.vlgmr.msra.gmra.mxu0 %v5514_v9  ;;  %4700 = vmatpush3.msra.mxu1 %v4068_v51  ;;  %v4078_v9 = vld [vmem:[%s6987_s2 + $0x148] sm:$0xff]  ;;  %403 = vst [vmem:[#allocation2 + $0x118] sm:$0x3] %v355_v8  ;;  %v4069_v47 = vld [vmem:[%s6987_s2 + $0x100] sm:$0xff]  ;;  %v418_v50 = vld [vmem:[%s5796_s9 + $0x10] sm:$0x3] }
  0x30   : > { %4779 = vmatprep.subr.mxu0 %v4084_v53  ;;  %4701 = vmatprep.subr.mxu1 %v4067_v54  ;;  %v830_v46 = vld [vmem:[#allocation2 + $0x1] sm:$0xff]  ;;  %v831_v49 = vld [vmem:[#allocation2 + $0x9] sm:$0xff]  ;;  %v4100_v52 = vld [vmem:[%s6987_s2 + $0x1f8] sm:$0xff]  ;;  %425 = vst [vmem:[#allocation2 + $0x190] sm:$0x3] %v418_v50 }
  0x31   : > { %4780 = vmatpush3.msra.mxu0 %v4084_v53  ;;  %4678 = vmatprep.mubr.f32.mxu1 %v5517_v10  ;;  %v4061_v10 = vld [vmem:[%s6987_s2 + $0xc0] sm:$0xff]  ;;  %v5814_v48 = vld [vmem:[%s5796_s9 + $0x8] sm:$0xff]  ;;  %v5841_v61 = vld [vmem:[#allocation2 + $0x31] sm:$0xff] }
  0x32   : > { %4702 = vmatpush3.msra.mxu1 %v4067_v54  ;;  %4781 = vmatprep.subr.mxu0 %v4083_v56  ;;  %424 = vst [vmem:[#allocation2 + $0x188] sm:$0xff] %v5814_v48  ;;  %v1200_v51 = vld [vmem:[#allocation2 + $0x2] sm:$0xff]  ;;  %v1201_v53 = vld [vmem:[#allocation2 + $0xa] sm:$0xff]  ;;  %v4116_v54 = vld [vmem:[%s6987_s2 + $0x278] sm:$0xff] }
  0x33   : > { %4654 = vmatprep.mubr.f32.mxu0 %v5520_v11  ;;  %4679 = vmatmul.mubr.f32.gmra.mxu1 %v5526_v12  ;;  %v4077_v12 = vld [vmem:[%s6987_s2 + $0x140] sm:$0xff]  ;;  %v5847_v63 = vld [vmem:[#allocation2 + $0x32] sm:$0xff]  ;;  %v5952_v50 = vld [vmem:[#allocation2 + $0xc9] sm:$0xff] }
  0x34   : > { %4703 = vmatprep.subr.mxu1 %v4066_v58  ;;  %4782 = vmatpush3.msra.mxu0 %v4083_v56  ;;  %v5825_v55 = vld [vmem:[#allocation2 + $0x19] sm:$0xff]  ;;  %v5827_v56 = vld [vmem:[#allocation2 + $0x21] sm:$0xff]  ;;  %v5862_v4 = vld [vmem:[#allocation2 + $0x51] sm:$0xff] }
  0x35   : > { %4655 = vmatmul.mubr.f32.gmra.mxu0 %v5529_v13  ;;  %4704 = vmatpush3.msra.mxu1 %v4066_v58  ;;  %v5829_v57 = vld [vmem:[#allocation2 + $0x1a] sm:$0xff]  ;;  %v4099_v58 = vld [vmem:[%s6987_s2 + $0x1f0] sm:$0xff] }
  0x36   : > { %4783 = vmatprep.subr.mxu0 %v4082_v59  ;;  %4705 = vmatprep.subr.mxu1 %v4065_v60  ;;  %v5853_v1 = vld [vmem:[#allocation2 + $0x3a] sm:$0xff] }
  0x37   : > { %4784 = vmatpush3.msra.mxu0 %v4082_v59  ;;  %4681 = vmatprep.mubr.f32.mxu1 %v5537_v15  ;;  %v4060_v15 = vld [vmem:[%s6987_s2 + $0xb8] sm:$0xff]  ;;  %v5835_v59 = vld [vmem:[#allocation2 + $0x22] sm:$0xff] }
  0x38   : > { %4706 = vmatpush3.msra.mxu1 %v4065_v60  ;;  %4785 = vmatprep.subr.mxu0 %v4081_v62  ;;  %v4115_v60 = vld [vmem:[%s6987_s2 + $0x270] sm:$0xff]  ;;  %v4097_v6 = vld [vmem:[%s6987_s2 + $0x1e0] sm:$0xff]  ;;  %v4096_v14 = vld [vmem:[%s6987_s2 + $0x1d8] sm:$0xff] }
  0x39   : > { %4657 = vmatprep.mubr.f32.mxu0 %v5541_v16  ;;  %4682 = vmatmul.mubr.f32.gmra.mxu1 %v5544_v17  ;;  %v361_v17 = vld [vmem:[%s5499_s8 + $0x148] sm:$0x3]  ;;  %v4113_v8 = vld [vmem:[%s6987_s2 + $0x260] sm:$0xff] }
  0x3a   : > { %4707 = vmatprep.subr.mxu1 %v4064_v0  ;;  %4786 = vmatpush3.msra.mxu0 %v4081_v62  ;;  %409 = vst [vmem:[#allocation2 + $0x148] sm:$0x3] %v361_v17  ;;  %v5844_v62 = vld [vmem:[#allocation2 + $0x39] sm:$0xff] }
  0x3b   : > { %4658 = vmatmul.mubr.f32.gmra.mxu0 %v5552_v19  ;;  %4708 = vmatpush3.msra.mxu1 %v4064_v0  ;;  %v4098_v0 = vld [vmem:[%s6987_s2 + $0x1e8] sm:$0xff]  ;;  %v4112_v17 = vld [vmem:[%s6987_s2 + $0x258] sm:$0xff] }
  0x3c   : > { %4787 = vmatprep.subr.mxu0 %v4080_v2  ;;  %4709 = vmatprep.subr.mxu1 %v4063_v3  ;;  %v5901_v22 = vld [vmem:[#allocation2 + $0x7a] sm:$0xff] }
  0x3d   : > { %4788 = vmatpush3.msra.mxu0 %v4080_v2  ;;  %4684 = vmatprep.mubr.f32.mxu1 %v5556_v20  ;;  %v4059_v20 = vld [vmem:[%s6987_s2 + $0xb0] sm:$0xff]  ;;  %v4114_v2 = vld [vmem:[%s6987_s2 + $0x268] sm:$0xff] }
  0x3e   : > { %4710 = vmatpush3.msra.mxu1 %v4063_v3  ;;  %4789 = vmatprep.subr.mxu0 %v4079_v5  ;;  %v5859_v3 = vld [vmem:[#allocation2 + $0x49] sm:$0xff] }
  0x3f   : > { %4660 = vmatprep.mubr.f32.mxu0 %v5559_v21  ;;  %4685 = vmatmul.mubr.f32.gmra.mxu1 %v5567_v23  ;;  %v4075_v23 = vld [vmem:[%s6987_s2 + $0x130] sm:$0xff] }
  0x40   : > { %4711 = vmatprep.subr.mxu1 %v4062_v7  ;;  %4790 = vmatpush3.msra.mxu0 %v4079_v5  ;;  %v5865_v5 = vld [vmem:[#allocation2 + $0x4a] sm:$0xff] }
  0x41   : > { %4661 = vmatmul.mubr.f32.gmra.mxu0 %v5570_v24  ;;  %4712 = vmatpush3.msra.mxu1 %v4062_v7  ;;  %v5871_v7 = vld [vmem:[#allocation2 + $0x52] sm:$0xff] }
  0x42   : > { %4791 = vmatprep.subr.mxu0 %v4078_v9  ;;  %4713 = vmatprep.subr.mxu1 %v4061_v10 }
  0x43   : > { %4792 = vmatpush3.msra.mxu0 %v4078_v9  ;;  %4687 = vmatprep.mubr.f32.mxu1 %v5575_v25  ;;  %v367_v25 = vld [vmem:[%s5499_s8 + $0x178] sm:$0x3]  ;;  %v5877_v9 = vld [vmem:[#allocation2 + $0x61] sm:$0xff] }
  0x44   : > { %4714 = vmatpush3.msra.mxu1 %v4061_v10  ;;  %4793 = vmatprep.subr.mxu0 %v4077_v12  ;;  %415 = vst [vmem:[#allocation2 + $0x178] sm:$0x3] %v367_v25  ;;  %v5880_v10 = vld [vmem:[#allocation2 + $0x69] sm:$0xff] }
  0x45   : > { %4663 = vmatprep.mubr.f32.mxu0 %v5582_v27  ;;  %4688 = vmatmul.mubr.f32.gmra.mxu1 %v5585_v28  ;;  %v4074_v28 = vld [vmem:[%s6987_s2 + $0x128] sm:$0xff] }
  0x46   : > { %4715 = vmatprep.subr.mxu1 %v4060_v15  ;;  %4794 = vmatpush3.msra.mxu0 %v4077_v12  ;;  %v5883_v12 = vld [vmem:[#allocation2 + $0x62] sm:$0xff] }
  0x47   : > { %4664 = vmatmul.mubr.f32.gmra.mxu0 %v5590_v29  ;;  %4716 = vmatpush3.msra.mxu1 %v4060_v15  ;;  %v5889_v15 = vld [vmem:[#allocation2 + $0x6a] sm:$0xff]  ;;  %v5907_v25 = vld [vmem:[#allocation2 + $0x82] sm:$0xff] }
  0x48   : > { %4795 = vmatprep.subr.mxu0 %v4076_v18  ;;  %4717 = vmatprep.subr.mxu1 %v4059_v20 }
  0x49   : > { %4796 = vmatpush3.msra.mxu0 %v4076_v18  ;;  %4690 = vmatprep.mubr.f32.mxu1 %v5597_v31  ;;  %v4073_v31 = vld [vmem:[%s6987_s2 + $0x120] sm:$0xff] }
  0x4a   : > { %4718 = vmatpush3.msra.mxu1 %v4059_v20  ;;  %4797 = vmatprep.subr.mxu0 %v4075_v23  ;;  %v5895_v18 = vld [vmem:[#allocation2 + $0x79] sm:$0xff]  ;;  %v5898_v20 = vld [vmem:[#allocation2 + $0x81] sm:$0xff] }
  0x4b   : > { %4666 = vmatprep.mubr.f32.mxu0 %v5601_v32  ;;  %4691 = vmatmul.mubr.f32.gmra.mxu1 %v5604_v33  ;;  %v4056_v33 = vld [vmem:[%s6987_s2 + $0x98] sm:$0xff] }
  0x4c   : > { %4719 = vmatprep.subr.mxu1 %v4058_v26  ;;  %4798 = vmatpush3.msra.mxu0 %v4075_v23  ;;  %v4095_v23 = vld [vmem:[%s6987_s2 + $0x1d0] sm:$0xff] }
  0x4d   : > { %4667 = vmatmul.mubr.f32.gmra.mxu0 %v5612_v35  ;;  %4720 = vmatpush3.msra.mxu1 %v4058_v26  ;;  %v4111_v26 = vld [vmem:[%s6987_s2 + $0x250] sm:$0xff] }
  0x4e   : > { %4799 = vmatprep.subr.mxu0 %v4074_v28  ;;  %4721 = vmatprep.subr.mxu1 %v4057_v30 }
  0x4f   : > { %4800 = vmatpush3.msra.mxu0 %v4074_v28  ;;  %4693 = vmatprep.mubr.f32.mxu1 %v5616_v36  ;;  %v4071_v36 = vld [vmem:[%s6987_s2 + $0x110] sm:$0xff] }
  0x50   : > { %4722 = vmatpush3.msra.mxu1 %v4057_v30  ;;  %4801 = vmatprep.subr.mxu0 %v4073_v31  ;;  %v5913_v28 = vld [vmem:[#allocation2 + $0x91] sm:$0xff]  ;;  %v5916_v30 = vld [vmem:[#allocation2 + $0x99] sm:$0xff] }
  0x51   : > { %4669 = vmatprep.mubr.f32.mxu0 %v5619_v37  ;;  %4694 = vmatmul.mubr.f32.gmra.mxu1 %v5627_v39  ;;  %v4054_v39 = vld [vmem:[%s6987_s2 + $0x88] sm:$0xff] }
  0x52   : > { %4723 = vmatprep.subr.mxu1 %v4056_v33  ;;  %4802 = vmatpush3.msra.mxu0 %v4073_v31  ;;  %v5919_v31 = vld [vmem:[#allocation2 + $0x92] sm:$0xff] }
  0x53   : > { %4670 = vmatmul.mubr.f32.gmra.mxu0 %v5630_v40  ;;  %4724 = vmatpush3.msra.mxu1 %v4056_v33  ;;  %v4094_v33 = vld [vmem:[%s6987_s2 + $0x1c8] sm:$0xff] }
  0x54   : > { %4803 = vmatprep.subr.mxu0 %v4072_v34  ;;  %4725 = vmatprep.subr.mxu1 %v4055_v38 }
  0x55   : > { %4804 = vmatpush3.msra.mxu0 %v4072_v34  ;;  %4696 = vmatprep.mubr.f32.mxu1 %v5635_v41  ;;  %v4070_v41 = vld [vmem:[%s6987_s2 + $0x108] sm:$0xff]  ;;  %v5925_v34 = vld [vmem:[#allocation2 + $0x9a] sm:$0xff] }
  0x56   : > { %4726 = vmatpush3.msra.mxu1 %v4055_v38  ;;  %4805 = vmatprep.subr.mxu0 %v4071_v36  ;;  %7008 = vst [vmem:[#allocation4_spill] sm:$0xff] %v5925_v34  ;;  %v4110_v38 = vld [vmem:[%s6987_s2 + $0x248] sm:$0xff] }
  0x57   : > { %4672 = vmatprep.mubr.f32.mxu0 %v5642_v43  ;;  %4697 = vmatmul.mubr.f32.gmra.mxu1 %v5645_v44  ;;  %v5811_v44 = vld [vmem:[%s5796_s9] sm:$0xff] }
  0x58   : > { %4727 = vmatprep.subr.mxu1 %v4054_v39  ;;  %4806 = vmatpush3.msra.mxu0 %v4071_v36  ;;  %423 = vst [vmem:[#allocation2 + $0x180] sm:$0xff] %v5811_v44  ;;  %v5931_v36 = vld [vmem:[#allocation2 + $0xa9] sm:$0xff] }
  0x59   : > { %4673 = vmatmul.mubr.f32.gmra.mxu0 %v5650_v45  ;;  %4728 = vmatpush3.msra.mxu1 %v4054_v39  ;;  %v5934_v39 = vld [vmem:[#allocation2 + $0xb1] sm:$0xff] }
  0x5a   : > { %4807 = vmatprep.subr.mxu0 %v4070_v41  ;;  %4729 = vmatprep.subr.mxu1 %v4053_v42 }
  0x5b   : > { %4808 = vmatpush3.msra.mxu0 %v4070_v41  ;;  %4730 = vmatpush3.msra.mxu1 %v4053_v42  ;;  %v5937_v41 = vld [vmem:[#allocation2 + $0xaa] sm:$0xff]  ;;  %v4093_v42 = vld [vmem:[%s6987_s2 + $0x1c0] sm:$0xff] }
  0x5c   : > { %4731 = vmatprep.mubr.f32.mxu1 %v830_v46  ;;  %4809 = vmatprep.subr.mxu0 %v4069_v47  ;;  %7009 = vst [vmem:[#allocation5_spill] sm:$0xff] %v5937_v41  ;;  %v5943_v46 = vld [vmem:[#allocation2 + $0xb2] sm:$0xff] }
  0x5d   : > { %4732 = vmatmul.mubr.f32.vlgmr.msra.gmra.mxu1 %v831_v49  ;;  %4810 = vmatpush3.msra.mxu0 %v4069_v47  ;;  %7010 = vst [vmem:[#allocation6_spill] sm:$0xff] %v5943_v46  ;;  %v4109_v47 = vld [vmem:[%s6987_s2 + $0x240] sm:$0xff] }
  0x5e   : > { %4811 = vmatprep.mubr.f32.mxu0 %v1200_v51  ;;  %4859 = vmatprep.subr.mxu1 %v4100_v52  ;;  %v5949_v49 = vld [vmem:[#allocation2 + $0xc1] sm:$0xff] }
  0x5f   : > { %4812 = vmatmul.mubr.f32.vlgmr.msra.gmra.mxu0 %v1201_v53  ;;  %4860 = vmatpush3.msra.mxu1 %v4100_v52  ;;  %v5955_v51 = vld [vmem:[#allocation2 + $0xc2] sm:$0xff]  ;;  %v4092_v52 = vld [vmem:[%s6987_s2 + $0x1b8] sm:$0xff]  ;;  %v5961_v53 = vld [vmem:[#allocation2 + $0xca] sm:$0xff] }
  0x60   : > { %4939 = vmatprep.subr.mxu0 %v4116_v54  ;;  %4734 = vmatprep.mubr.f32.mxu1 %v5825_v55  ;;  %7011 = vst [vmem:[#allocation7_spill] sm:$0xff] %v5955_v51  ;;  %7012 = vst [vmem:[#allocation8_spill] sm:$0xff] %v5961_v53 }
  0x61   : > { %4940 = vmatpush3.msra.mxu0 %v4116_v54  ;;  %4735 = vmatmul.mubr.f32.gmra.mxu1 %v5827_v56  ;;  %v4108_v54 = vld [vmem:[%s6987_s2 + $0x238] sm:$0xff] }
  0x62   : > { %4814 = vmatprep.mubr.f32.mxu0 %v5829_v57  ;;  %4861 = vmatprep.subr.mxu1 %v4099_v58 }
  0x63   : > { %4815 = vmatmul.mubr.f32.gmra.mxu0 %v5835_v59  ;;  %4862 = vmatpush3.msra.mxu1 %v4099_v58  ;;  %v5967_v58 = vld [vmem:[#allocation2 + $0xd9] sm:$0xff] }
  0x64   : > { %4941 = vmatprep.subr.mxu0 %v4115_v60  ;;  %4737 = vmatprep.mubr.f32.mxu1 %v5841_v61 }
  0x65   : > { %4942 = vmatpush3.msra.mxu0 %v4115_v60  ;;  %4738 = vmatmul.mubr.f32.gmra.mxu1 %v5844_v62  ;;  %v5970_v60 = vld [vmem:[#allocation2 + $0xe1] sm:$0xff] }
  0x66   : > { %4817 = vmatprep.mubr.f32.mxu0 %v5847_v63  ;;  %4863 = vmatprep.subr.mxu1 %v4098_v0 }
  0x67   : > { %4818 = vmatmul.mubr.f32.gmra.mxu0 %v5853_v1  ;;  %4864 = vmatpush3.msra.mxu1 %v4098_v0  ;;  %v5973_v0 = vld [vmem:[#allocation2 + $0xda] sm:$0xff] }
  0x68   : > { %4943 = vmatprep.subr.mxu0 %v4114_v2  ;;  %4740 = vmatprep.mubr.f32.mxu1 %v5859_v3  ;;  %7013 = vst [vmem:[#allocation9_spill] sm:$0xff] %v5973_v0 }
  0x69   : > { %4944 = vmatpush3.msra.mxu0 %v4114_v2  ;;  %4741 = vmatmul.mubr.f32.gmra.mxu1 %v5862_v4  ;;  %v4091_v2 = vld [vmem:[%s6987_s2 + $0x1b0] sm:$0xff] }
  0x6a   : > { %4820 = vmatprep.mubr.f32.mxu0 %v5865_v5  ;;  %4865 = vmatprep.subr.mxu1 %v4097_v6 }
  0x6b   : > { %4821 = vmatmul.mubr.f32.gmra.mxu0 %v5871_v7  ;;  %4866 = vmatpush3.msra.mxu1 %v4097_v6  ;;  %v5979_v6 = vld [vmem:[#allocation2 + $0xe2] sm:$0xff] }
  0x6c   : > { %4945 = vmatprep.subr.mxu0 %v4113_v8  ;;  %4743 = vmatprep.mubr.f32.mxu1 %v5877_v9  ;;  %7014 = vst [vmem:[#allocation10_spill] sm:$0xff] %v5979_v6 }
  0x6d   : > { %4946 = vmatpush3.msra.mxu0 %v4113_v8  ;;  %4744 = vmatmul.mubr.f32.gmra.mxu1 %v5880_v10  ;;  %v4107_v8 = vld [vmem:[%s6987_s2 + $0x230] sm:$0xff] }
  0x6e   : > { %4823 = vmatprep.mubr.f32.mxu0 %v5883_v12  ;;  %4867 = vmatprep.subr.mxu1 %v4096_v14 }
  0x6f   : > { %4824 = vmatmul.mubr.f32.gmra.mxu0 %v5889_v15  ;;  %4868 = vmatpush3.msra.mxu1 %v4096_v14  ;;  %v5985_v14 = vld [vmem:[#allocation2 + $0xf1] sm:$0xff] }
  0x70   : > { %4947 = vmatprep.subr.mxu0 %v4112_v17  ;;  %4746 = vmatprep.mubr.f32.mxu1 %v5895_v18 }
  0x71   : > { %4948 = vmatpush3.msra.mxu0 %v4112_v17  ;;  %4747 = vmatmul.mubr.f32.gmra.mxu1 %v5898_v20  ;;  %v5988_v17 = vld [vmem:[#allocation2 + $0xf9] sm:$0xff] }
  0x72   : > { %4826 = vmatprep.mubr.f32.mxu0 %v5901_v22  ;;  %4869 = vmatprep.subr.mxu1 %v4095_v23 }
  0x73   : > { %4827 = vmatmul.mubr.f32.gmra.mxu0 %v5907_v25  ;;  %4870 = vmatpush3.msra.mxu1 %v4095_v23  ;;  %v5991_v23 = vld [vmem:[#allocation2 + $0xf2] sm:$0xff] }
  0x74   : > { %4949 = vmatprep.subr.mxu0 %v4111_v26  ;;  %4749 = vmatprep.mubr.f32.mxu1 %v5913_v28  ;;  %7015 = vst [vmem:[#allocation11_spill] sm:$0xff] %v5991_v23 }
  0x75   : > { %4950 = vmatpush3.msra.mxu0 %v4111_v26  ;;  %4750 = vmatmul.mubr.f32.gmra.mxu1 %v5916_v30  ;;  %v4090_v26 = vld [vmem:[%s6987_s2 + $0x1a8] sm:$0xff] }
  0x76   : > { %4829 = vmatprep.mubr.f32.mxu0 %v5919_v31  ;;  %4871 = vmatprep.subr.mxu1 %v4094_v33 }
  0x77   : > { %4830 = vmatmul.mubr.f32.gmra.mxu0 %v5925_v34  ;;  %4872 = vmatpush3.msra.mxu1 %v4094_v33  ;;  %v5997_v33 = vld [vmem:[#allocation2 + $0xfa] sm:$0xff]  ;;  %v6087_v34 = vld [vmem:[#allocation2 + $0x172] sm:$0xff] }
  0x78   : > { %4951 = vmatprep.subr.mxu0 %v4110_v38  ;;  %4752 = vmatprep.mubr.f32.mxu1 %v5931_v36  ;;  %7016 = vst [vmem:[#allocation12_spill] sm:$0xff] %v5997_v33 }
  0x79   : > { %4952 = vmatpush3.msra.mxu0 %v4110_v38  ;;  %4753 = vmatmul.mubr.f32.gmra.mxu1 %v5934_v39  ;;  %v4106_v38 = vld [vmem:[%s6987_s2 + $0x228] sm:$0xff] }
  0x7a   : > { %4832 = vmatprep.mubr.f32.mxu0 %v5937_v41  ;;  %4873 = vmatprep.subr.mxu1 %v4093_v42  ;;  %v6081_v41 = vld [vmem:[#allocation2 + $0x16a] sm:$0xff] }
  0x7b   : > { %4833 = vmatmul.mubr.f32.gmra.mxu0 %v5943_v46  ;;  %4874 = vmatpush3.msra.mxu1 %v4093_v42  ;;  %v6003_v42 = vld [vmem:[#allocation2 + $0x109] sm:$0xff]  ;;  %v6069_v46 = vld [vmem:[#allocation2 + $0x15a] sm:$0xff] }
  0x7c   : > { %4953 = vmatprep.subr.mxu0 %v4109_v47  ;;  %4755 = vmatprep.mubr.f32.mxu1 %v5949_v49  ;;  %7024 = vst [vmem:[#allocation20_spill] sm:$0xff] %v6069_v46 }
  0x7d   : > { %4954 = vmatpush3.msra.mxu0 %v4109_v47  ;;  %4756 = vmatmul.mubr.f32.gmra.mxu1 %v5952_v50  ;;  %v6006_v47 = vld [vmem:[#allocation2 + $0x111] sm:$0xff] }
  0x7e   : > { %4835 = vmatprep.mubr.f32.mxu0 %v5955_v51  ;;  %4875 = vmatprep.subr.mxu1 %v4092_v52  ;;  %v6063_v51 = vld [vmem:[#allocation2 + $0x152] sm:$0xff] }
  0x7f   : > { %4836 = vmatmul.mubr.f32.gmra.mxu0 %v5961_v53  ;;  %4876 = vmatpush3.msra.mxu1 %v4092_v52  ;;  %v6009_v52 = vld [vmem:[#allocation2 + $0x10a] sm:$0xff]  ;;  %v6051_v53 = vld [vmem:[#allocation2 + $0x142] sm:$0xff]  ;;  %7023 = vst [vmem:[#allocation19_spill] sm:$0xff] %v6063_v51 }
  0x80   : > { %4955 = vmatprep.subr.mxu0 %v4108_v54  ;;  %4758 = vmatprep.mubr.f32.mxu1 %v5967_v58  ;;  %7017 = vst [vmem:[#allocation13_spill] sm:$0xff] %v6009_v52  ;;  %7022 = vst [vmem:[#allocation18_spill] sm:$0xff] %v6051_v53 }
  0x81   : > { %4956 = vmatpush3.msra.mxu0 %v4108_v54  ;;  %4759 = vmatmul.mubr.f32.gmra.mxu1 %v5970_v60  ;;  %v4089_v54 = vld [vmem:[%s6987_s2 + $0x1a0] sm:$0xff] }
  0x82   : > { %4838 = vmatprep.mubr.f32.mxu0 %v5973_v0  ;;  %4877 = vmatprep.subr.mxu1 %v4091_v2  ;;  %v6045_v0 = vld [vmem:[#allocation2 + $0x13a] sm:$0xff] }
  0x83   : > { %4839 = vmatmul.mubr.f32.gmra.mxu0 %v5979_v6  ;;  %4878 = vmatpush3.msra.mxu1 %v4091_v2  ;;  %v6015_v2 = vld [vmem:[#allocation2 + $0x112] sm:$0xff]  ;;  %v6033_v6 = vld [vmem:[#allocation2 + $0x12a] sm:$0xff]  ;;  %7021 = vst [vmem:[#allocation17_spill] sm:$0xff] %v6045_v0 }
  0x84   : > { %4957 = vmatprep.subr.mxu0 %v4107_v8  ;;  %4761 = vmatprep.mubr.f32.mxu1 %v5985_v14  ;;  %7018 = vst [vmem:[#allocation14_spill] sm:$0xff] %v6015_v2  ;;  %7020 = vst [vmem:[#allocation16_spill] sm:$0xff] %v6033_v6 }
  0x85   : > { %4958 = vmatpush3.msra.mxu0 %v4107_v8  ;;  %4762 = vmatmul.mubr.f32.gmra.mxu1 %v5988_v17  ;;  %v4105_v8 = vld [vmem:[%s6987_s2 + $0x220] sm:$0xff] }
  0x86   : > { %4841 = vmatprep.mubr.f32.mxu0 %v5991_v23  ;;  %4879 = vmatprep.subr.mxu1 %v4090_v26  ;;  %v6027_v23 = vld [vmem:[#allocation2 + $0x122] sm:$0xff] }
  0x87   : > { %4842 = vmatmul.mubr.f32.gmra.mxu0 %v5997_v33  ;;  %4880 = vmatpush3.msra.mxu1 %v4090_v26  ;;  %v6021_v33 = vld [vmem:[#allocation2 + $0x121] sm:$0xff]  ;;  %v6024_v26 = vld [vmem:[#allocation2 + $0x129] sm:$0xff]  ;;  %7019 = vst [vmem:[#allocation15_spill] sm:$0xff] %v6027_v23 }
  0x88   : > { %4959 = vmatprep.subr.mxu0 %v4106_v38  ;;  %4764 = vmatprep.mubr.f32.mxu1 %v6003_v42 }
  0x89   : > { %4960 = vmatpush3.msra.mxu0 %v4106_v38  ;;  %4765 = vmatmul.mubr.f32.gmra.mxu1 %v6006_v47  ;;  %v4088_v38 = vld [vmem:[%s6987_s2 + $0x198] sm:$0xff] }
  0x8a   : > { %4844 = vmatprep.mubr.f32.mxu0 %v6009_v52  ;;  %4881 = vmatprep.subr.mxu1 %v4089_v54  ;;  %v4104_v52 = vld [vmem:[%s6987_s2 + $0x218] sm:$0xff] }
  0x8b   : > { %4845 = vmatmul.mubr.f32.gmra.mxu0 %v6015_v2  ;;  %4882 = vmatpush3.msra.mxu1 %v4089_v54  ;;  %v6039_v2 = vld [vmem:[#allocation2 + $0x139] sm:$0xff]  ;;  %v6042_v54 = vld [vmem:[#allocation2 + $0x141] sm:$0xff] }
  0x8c   : > { %4961 = vmatprep.subr.mxu0 %v4105_v8  ;;  %4767 = vmatprep.mubr.f32.mxu1 %v6021_v33 }
  0x8d   : > { %4962 = vmatpush3.msra.mxu0 %v4105_v8  ;;  %4768 = vmatmul.mubr.f32.gmra.mxu1 %v6024_v26  ;;  %v4087_v8 = vld [vmem:[%s6987_s2 + $0x190] sm:$0xff] }
  0x8e   : > { %4847 = vmatprep.mubr.f32.mxu0 %v6027_v23  ;;  %4883 = vmatprep.subr.mxu1 %v4088_v38  ;;  %v4103_v23 = vld [vmem:[%s6987_s2 + $0x210] sm:$0xff] }
  0x8f   : > { %4848 = vmatmul.mubr.f32.gmra.mxu0 %v6033_v6  ;;  %4884 = vmatpush3.msra.mxu1 %v4088_v38  ;;  %v6057_v6 = vld [vmem:[#allocation2 + $0x151] sm:$0xff]  ;;  %v6060_v38 = vld [vmem:[#allocation2 + $0x159] sm:$0xff] }
  0x90   : > { %4963 = vmatprep.subr.mxu0 %v4104_v52  ;;  %4770 = vmatprep.mubr.f32.mxu1 %v6039_v2 }
  0x91   : > { %4964 = vmatpush3.msra.mxu0 %v4104_v52  ;;  %4771 = vmatmul.mubr.f32.gmra.mxu1 %v6042_v54  ;;  %v4086_v52 = vld [vmem:[%s6987_s2 + $0x188] sm:$0xff] }
  0x92   : > { %4850 = vmatprep.mubr.f32.mxu0 %v6045_v0  ;;  %4885 = vmatprep.subr.mxu1 %v4087_v8  ;;  %v6078_v0 = vld [vmem:[#allocation2 + $0x171] sm:$0xff] }
  0x93   : > { %4851 = vmatmul.mubr.f32.gmra.mxu0 %v6051_v53  ;;  %4886 = vmatpush3.msra.mxu1 %v4087_v8  ;;  %v4102_v53 = vld [vmem:[%s6987_s2 + $0x208] sm:$0xff] }
  0x94   : > { %4965 = vmatprep.subr.mxu0 %v4103_v23  ;;  %4773 = vmatprep.mubr.f32.mxu1 %v6057_v6  ;;  %v6075_v8 = vld [vmem:[#allocation2 + $0x169] sm:$0xff] }
  0x95   : > { %4966 = vmatpush3.msra.mxu0 %v4103_v23  ;;  %4774 = vmatmul.mubr.f32.gmra.mxu1 %v6060_v38  ;;  %v4085_v23 = vld [vmem:[%s6987_s2 + $0x180] sm:$0xff] }
  0x96   : > { %4853 = vmatprep.mubr.f32.mxu0 %v6063_v51  ;;  %4887 = vmatprep.subr.mxu1 %v4086_v52  ;;  %v4101_v51 = vld [vmem:[%s6987_s2 + $0x200] sm:$0xff] }
  0x97   : > { %4854 = vmatmul.mubr.f32.gmra.mxu0 %v6069_v46  ;;  %4888 = vmatpush3.msra.mxu1 %v4086_v52  ;;  %v6094_v46 = vld [vmem:[%s5796_s9 + $0x18] sm:$0xff]  ;;  %v6099_v52 = vld [vmem:[%s5796_s9 + $0x20] sm:$0xff] }
  0x98   : > { %4967 = vmatprep.subr.mxu0 %v4102_v53  ;;  %4776 = vmatprep.mubr.f32.mxu1 %v6075_v8  ;;  %7025 = vst [vmem:[#allocation21_spill] sm:$0xff] %v6094_v46  ;;  %426 = vst [vmem:[#allocation2 + $0x198] sm:$0xff] %v6094_v46  ;;  %v4148_v46 = vld [vmem:[%s6987_s2 + $0x378] sm:$0xff] }
  0x99   : > { %4968 = vmatpush3.msra.mxu0 %v4102_v53  ;;  %4777 = vmatmul.mubr.f32.gmra.mxu1 %v6078_v0  ;;  %v4132_v53 = vld [vmem:[%s6987_s2 + $0x2f8] sm:$0xff]  ;;  %427 = vst [vmem:[#allocation2 + $0x1a0] sm:$0xff] %v6099_v52 }
  0x9a   : > { %4856 = vmatprep.mubr.f32.mxu0 %v6081_v41  ;;  %4889 = vmatprep.subr.mxu1 %v4085_v23 }
  0x9b   : > { %4857 = vmatmul.mubr.f32.gmra.mxu0 %v6087_v34  ;;  %4890 = vmatpush3.msra.mxu1 %v4085_v23  ;;  %v4131_v23 = vld [vmem:[%s6987_s2 + $0x2f0] sm:$0xff] }
  0x9c   : > { %4969 = vmatprep.subr.mxu0 %v4101_v51  ;;  %4891 = vmatprep.mubr.f32.mxu1 %v5520_v11  ;;  %v4147_v11 = vld [vmem:[%s6987_s2 + $0x370] sm:$0xff] }
  0x9d   : > { %4970 = vmatpush3.msra.mxu0 %v4101_v51  ;;  %4892 = vmatmul.mubr.f32.vlgmr.msra.gmra.mxu1 %v5529_v13  ;;  %v4130_v13 = vld [vmem:[%s6987_s2 + $0x2e8] sm:$0xff]  ;;  %v4120_v51 = vld [vmem:[%s6987_s2 + $0x298] sm:$0xff] }
  0x9e   : > { %4971 = vmatprep.mubr.f32.mxu0 %v5825_v55  ;;  %5019 = vmatprep.subr.mxu1 %v4132_v53  ;;  %v6174_v55 = vld [vmem:[#allocation2 + $0xc8] sm:$0xff] }
  0x9f   : > { %4972 = vmatmul.mubr.f32.vlgmr.msra.gmra.mxu0 %v5827_v56  ;;  %5020 = vmatpush3.msra.mxu1 %v4132_v53  ;;  %v6185_v56 = vld [vmem:[#allocation2 + $0xd8] sm:$0xff]  ;;  %v5403_v53 = vld [vmem:[#allocation2 + $0x170] sm:$0xff] }
  0xa0   : > { %5099 = vmatprep.subr.mxu0 %v4148_v46  ;;  %4894 = vmatprep.mubr.f32.mxu1 %v5541_v16  ;;  %v4146_v16 = vld [vmem:[%s6987_s2 + $0x368] sm:$0xff] }
  0xa1   : > { %5100 = vmatpush3.msra.mxu0 %v4148_v46  ;;  %4895 = vmatmul.mubr.f32.gmra.mxu1 %v5552_v19  ;;  %v4129_v19 = vld [vmem:[%s6987_s2 + $0x2e0] sm:$0xff]  ;;  %v6230_v46 = vld [vmem:[#allocation2 + $0x128] sm:$0xff] }
  0xa2   : > { %4974 = vmatprep.mubr.f32.mxu0 %v5841_v61  ;;  %5021 = vmatprep.subr.mxu1 %v4131_v23  ;;  %v6188_v61 = vld [vmem:[#allocation2 + $0xe0] sm:$0xff] }
  0xa3   : > { %4975 = vmatmul.mubr.f32.gmra.mxu0 %v5844_v62  ;;  %5022 = vmatpush3.msra.mxu1 %v4131_v23  ;;  %v4124_v62 = vld [vmem:[%s6987_s2 + $0x2b8] sm:$0xff]  ;;  %v4117_v23 = vld [vmem:[%s6987_s2 + $0x280] sm:$0xff] }
  0xa4   : > { %5101 = vmatprep.subr.mxu0 %v4147_v11  ;;  %4897 = vmatprep.mubr.f32.mxu1 %v5559_v21  ;;  %v4145_v21 = vld [vmem:[%s6987_s2 + $0x360] sm:$0xff] }
  0xa5   : > { %5102 = vmatpush3.msra.mxu0 %v4147_v11  ;;  %4898 = vmatmul.mubr.f32.gmra.mxu1 %v5570_v24  ;;  %v4128_v24 = vld [vmem:[%s6987_s2 + $0x2d8] sm:$0xff]  ;;  %v6274_v11 = vld [vmem:[#allocation2 + $0x189] sm:$0xff] }
  0xa6   : > { %4977 = vmatprep.mubr.f32.mxu0 %v5859_v3  ;;  %5023 = vmatprep.subr.mxu1 %v4130_v13  ;;  %v4140_v3 = vld [vmem:[%s6987_s2 + $0x338] sm:$0xff] }
  0xa7   : > { %4978 = vmatmul.mubr.f32.gmra.mxu0 %v5862_v4  ;;  %5024 = vmatpush3.msra.mxu1 %v4130_v13  ;;  %v6199_v4 = vld [vmem:[#allocation2 + $0xf0] sm:$0xff]  ;;  %v2683_v13 = vld [vmem:[#allocation2 + $0x38] sm:$0xff] }
  0xa8   : > { %5103 = vmatprep.subr.mxu0 %v4146_v16  ;;  %4900 = vmatprep.mubr.f32.mxu1 %v5582_v27  ;;  %v4144_v27 = vld [vmem:[%s6987_s2 + $0x358] sm:$0xff] }
  0xa9   : > { %5104 = vmatpush3.msra.mxu0 %v4146_v16  ;;  %4901 = vmatmul.mubr.f32.gmra.mxu1 %v5590_v29  ;;  %v4127_v29 = vld [vmem:[%s6987_s2 + $0x2d0] sm:$0xff]  ;;  %v2684_v16 = vld [vmem:[#allocation2 + $0x48] sm:$0xff] }
  0xaa   : > { %4980 = vmatprep.mubr.f32.mxu0 %v5877_v9  ;;  %5025 = vmatprep.subr.mxu1 %v4129_v19  ;;  %v6202_v9 = vld [vmem:[#allocation2 + $0xf8] sm:$0xff] }
  0xab   : > { %4981 = vmatmul.mubr.f32.gmra.mxu0 %v5880_v10  ;;  %5026 = vmatpush3.msra.mxu1 %v4129_v19  ;;  %v4123_v10 = vld [vmem:[%s6987_s2 + $0x2b0] sm:$0xff] }
  0xac   : > { %5105 = vmatprep.subr.mxu0 %v4145_v21  ;;  %4903 = vmatprep.mubr.f32.mxu1 %v5601_v32  ;;  %v4143_v32 = vld [vmem:[%s6987_s2 + $0x350] sm:$0xff] }
  0xad   : > { %5106 = vmatpush3.msra.mxu0 %v4145_v21  ;;  %4904 = vmatmul.mubr.f32.gmra.mxu1 %v5612_v35  ;;  %v4126_v35 = vld [vmem:[%s6987_s2 + $0x2c8] sm:$0xff]  ;;  %v4163_v19 = vld [vmem:[%s6987_s2 + $0x3f0] sm:$0xff]  ;;  %v2686_v21 = vld [vmem:[#allocation2 + $0x60] sm:$0xff] }
  0xae   : > { %4983 = vmatprep.mubr.f32.mxu0 %v5895_v18  ;;  %5027 = vmatprep.subr.mxu1 %v4128_v24  ;;  %v4139_v18 = vld [vmem:[%s6987_s2 + $0x330] sm:$0xff] }
  0xaf   : > { %4984 = vmatmul.mubr.f32.gmra.mxu0 %v5898_v20  ;;  %5028 = vmatpush3.msra.mxu1 %v4128_v24  ;;  %v6213_v20 = vld [vmem:[#allocation2 + $0x108] sm:$0xff] }
  0xb0   : > { %5107 = vmatprep.subr.mxu0 %v4144_v27  ;;  %4906 = vmatprep.mubr.f32.mxu1 %v5619_v37  ;;  %v4142_v37 = vld [vmem:[%s6987_s2 + $0x348] sm:$0xff] }
  0xb1   : > { %5108 = vmatpush3.msra.mxu0 %v4144_v27  ;;  %4907 = vmatmul.mubr.f32.gmra.mxu1 %v5630_v40  ;;  %v6171_v40 = vld [vmem:[#allocation2 + $0xc0] sm:$0xff]  ;;  %v4162_v24 = vld [vmem:[%s6987_s2 + $0x3e8] sm:$0xff]  ;;  %v2688_v27 = vld [vmem:[#allocation2 + $0x78] sm:$0xff] }
  0xb2   : > { %4986 = vmatprep.mubr.f32.mxu0 %v5913_v28  ;;  %5029 = vmatprep.subr.mxu1 %v4127_v29  ;;  %v6216_v28 = vld [vmem:[#allocation2 + $0x110] sm:$0xff] }
  0xb3   : > { %4987 = vmatmul.mubr.f32.gmra.mxu0 %v5916_v30  ;;  %5030 = vmatpush3.msra.mxu1 %v4127_v29  ;;  %v4122_v30 = vld [vmem:[%s6987_s2 + $0x2a8] sm:$0xff]  ;;  %v4161_v29 = vld [vmem:[%s6987_s2 + $0x3e0] sm:$0xff] }
  0xb4   : > { %5109 = vmatprep.subr.mxu0 %v4143_v32  ;;  %4909 = vmatprep.mubr.f32.mxu1 %v5642_v43  ;;  %v4125_v43 = vld [vmem:[%s6987_s2 + $0x2c0] sm:$0xff] }
  0xb5   : > { %5110 = vmatpush3.msra.mxu0 %v4143_v32  ;;  %4910 = vmatmul.mubr.f32.gmra.mxu1 %v5650_v45  ;;  %v4141_v45 = vld [vmem:[%s6987_s2 + $0x340] sm:$0xff]  ;;  %v2690_v32 = vld [vmem:[#allocation2 + $0x90] sm:$0xff] }
  0xb6   : > { %4989 = vmatprep.mubr.f32.mxu0 %v5931_v36  ;;  %5031 = vmatprep.subr.mxu1 %v4126_v35  ;;  %v4138_v36 = vld [vmem:[%s6987_s2 + $0x328] sm:$0xff] }
  0xb7   : > { %4990 = vmatmul.mubr.f32.gmra.mxu0 %v5934_v39  ;;  %5032 = vmatpush3.msra.mxu1 %v4126_v35  ;;  %v6227_v39 = vld [vmem:[#allocation2 + $0x120] sm:$0xff]  ;;  %v4160_v35 = vld [vmem:[%s6987_s2 + $0x3d8] sm:$0xff] }
  0xb8   : > { %5111 = vmatprep.subr.mxu0 %v4142_v37  ;;  %4912 = vmatprep.mubr.f32.mxu1 %v6171_v40 }
  0xb9   : > { %5112 = vmatpush3.msra.mxu0 %v4142_v37  ;;  %4913 = vmatmul.mubr.f32.gmra.mxu1 %v6174_v55 }
  0xba   : > { %4992 = vmatprep.mubr.f32.mxu0 %v5949_v49  ;;  %5033 = vmatprep.subr.mxu1 %v4125_v43  ;;  %v4121_v49 = vld [vmem:[%s6987_s2 + $0x2a0] sm:$0xff] }
  0xbb   : > { %4993 = vmatmul.mubr.f32.gmra.mxu0 %v5952_v50  ;;  %5034 = vmatpush3.msra.mxu1 %v4125_v43  ;;  %v4137_v50 = vld [vmem:[%s6987_s2 + $0x320] sm:$0xff]  ;;  %v2692_v43 = vld [vmem:[#allocation2 + $0xa8] sm:$0xff] }
  0xbc   : > { %5113 = vmatprep.subr.mxu0 %v4141_v45  ;;  %4915 = vmatprep.mubr.f32.mxu1 %v6185_v56 }
  0xbd   : > { %5114 = vmatpush3.msra.mxu0 %v4141_v45  ;;  %4916 = vmatmul.mubr.f32.gmra.mxu1 %v6188_v61  ;;  %v4159_v45 = vld [vmem:[%s6987_s2 + $0x3d0] sm:$0xff] }
  0xbe   : > { %4995 = vmatprep.mubr.f32.mxu0 %v5967_v58  ;;  %5035 = vmatprep.subr.mxu1 %v4124_v62  ;;  %v5398_v58 = vld [vmem:[#allocation2 + $0x138] sm:$0xff] }
  0xbf   : > { %4996 = vmatmul.mubr.f32.gmra.mxu0 %v5970_v60  ;;  %5036 = vmatpush3.msra.mxu1 %v4124_v62  ;;  %v5399_v60 = vld [vmem:[#allocation2 + $0x140] sm:$0xff] }
  0xc0   : > { %5115 = vmatprep.subr.mxu0 %v4140_v3  ;;  %4918 = vmatprep.mubr.f32.mxu1 %v6199_v4 }
  0xc1   : > { %5116 = vmatpush3.msra.mxu0 %v4140_v3  ;;  %4919 = vmatmul.mubr.f32.gmra.mxu1 %v6202_v9  ;;  %v7026_v3 = vld [vmem:[#allocation4_spill] sm:$0xff] }
  0xc2   : > { %4998 = vmatprep.mubr.f32.mxu0 %v5985_v14  ;;  %5037 = vmatprep.subr.mxu1 %v4123_v10  ;;  %v4136_v14 = vld [vmem:[%s6987_s2 + $0x318] sm:$0xff] }
  0xc3   : > { %4999 = vmatmul.mubr.f32.gmra.mxu0 %v5988_v17  ;;  %5038 = vmatpush3.msra.mxu1 %v4123_v10  ;;  %v4119_v17 = vld [vmem:[%s6987_s2 + $0x290] sm:$0xff] }
  0xc4   : > { %5117 = vmatprep.subr.mxu0 %v4139_v18  ;;  %4921 = vmatprep.mubr.f32.mxu1 %v6213_v20  ;;  %v4175_v10 = vld [vmem:[%s6987_s2 + $0x450] sm:$0xff] }
  0xc5   : > { %5118 = vmatpush3.msra.mxu0 %v4139_v18  ;;  %4922 = vmatmul.mubr.f32.gmra.mxu1 %v6216_v28 }
  0xc6   : > { %5001 = vmatprep.mubr.f32.mxu0 %v6003_v42  ;;  %5039 = vmatprep.subr.mxu1 %v4122_v30  ;;  %v5401_v42 = vld [vmem:[#allocation2 + $0x158] sm:$0xff] }
  0xc7   : > { %5002 = vmatmul.mubr.f32.gmra.mxu0 %v6006_v47  ;;  %5040 = vmatpush3.msra.mxu1 %v4122_v30  ;;  %v4135_v47 = vld [vmem:[%s6987_s2 + $0x310] sm:$0xff] }
  0xc8   : > { %5119 = vmatprep.subr.mxu0 %v4138_v36  ;;  %4924 = vmatprep.mubr.f32.mxu1 %v6227_v39 }
  0xc9   : > { %5120 = vmatpush3.msra.mxu0 %v4138_v36  ;;  %4925 = vmatmul.mubr.f32.gmra.mxu1 %v6230_v46  ;;  %v7027_v36 = vld [vmem:[#allocation5_spill] sm:$0xff] }
  0xca   : > { %5004 = vmatprep.mubr.f32.mxu0 %v6021_v33  ;;  %5041 = vmatprep.subr.mxu1 %v4121_v49  ;;  %v5400_v33 = vld [vmem:[#allocation2 + $0x150] sm:$0xff] }
  0xcb   : > { %5005 = vmatmul.mubr.f32.gmra.mxu0 %v6024_v26  ;;  %5042 = vmatpush3.msra.mxu1 %v4121_v49  ;;  %v4118_v26 = vld [vmem:[%s6987_s2 + $0x288] sm:$0xff]  ;;  %v7028_v49 = vld [vmem:[#allocation6_spill] sm:$0xff] }
  0xcc   : > { %5121 = vmatprep.subr.mxu0 %v4137_v50  ;;  %4927 = vmatprep.mubr.f32.mxu1 %v5398_v58 }
  0xcd   : > { %5122 = vmatpush3.msra.mxu0 %v4137_v50  ;;  %4928 = vmatmul.mubr.f32.gmra.mxu1 %v5399_v60  ;;  %v4174_v50 = vld [vmem:[%s6987_s2 + $0x448] sm:$0xff]  ;;  %v4157_v60 = vld [vmem:[%s6987_s2 + $0x3c0] sm:$0xff] }
  0xce   : > { %5007 = vmatprep.mubr.f32.mxu0 %v6039_v2  ;;  %5043 = vmatprep.subr.mxu1 %v4120_v51  ;;  %v421_v2 = vld [vmem:[%s5796_s9 + $0x28] sm:$0x3] }
  0xcf   : > { %5008 = vmatmul.mubr.f32.gmra.mxu0 %v6042_v54  ;;  %5044 = vmatpush3.msra.mxu1 %v4120_v51  ;;  %428 = vst [vmem:[#allocation2 + $0x1a8] sm:$0x3] %v421_v2  ;;  %v5402_v54 = vld [vmem:[#allocation2 + $0x168] sm:$0xff] }
  0xd0   : > { %5123 = vmatprep.subr.mxu0 %v4136_v14  ;;  %4930 = vmatprep.mubr.f32.mxu1 %v5400_v33  ;;  %v7030_v33 = vld [vmem:[#allocation8_spill] sm:$0xff] }
  0xd1   : > { %5124 = vmatpush3.msra.mxu0 %v4136_v14  ;;  %4931 = vmatmul.mubr.f32.gmra.mxu1 %v5401_v42 }
  0xd2   : > { %5010 = vmatprep.mubr.f32.mxu0 %v6057_v6  ;;  %5045 = vmatprep.subr.mxu1 %v4119_v17  ;;  %v4134_v6 = vld [vmem:[%s6987_s2 + $0x308] sm:$0xff] }
  0xd3   : > { %5011 = vmatmul.mubr.f32.gmra.mxu0 %v6060_v38  ;;  %5046 = vmatpush3.msra.mxu1 %v4119_v17  ;;  %v6268_v38 = vld [vmem:[#allocation2 + $0x181] sm:$0xff] }
  0xd4   : > { %5125 = vmatprep.subr.mxu0 %v4135_v47  ;;  %4933 = vmatprep.mubr.f32.mxu1 %v5402_v54  ;;  %v7029_v17 = vld [vmem:[#allocation7_spill] sm:$0xff]  ;;  %v7032_v54 = vld [vmem:[#allocation10_spill] sm:$0xff] }
  0xd5   : > { %5126 = vmatpush3.msra.mxu0 %v4135_v47  ;;  %4934 = vmatmul.mubr.f32.gmra.mxu1 %v5403_v53  ;;  %v4155_v53 = vld [vmem:[%s6987_s2 + $0x3b0] sm:$0xff] }
  0xd6   : > { %5013 = vmatprep.mubr.f32.mxu0 %v6075_v8  ;;  %5047 = vmatprep.subr.mxu1 %v4118_v26  ;;  %v4133_v8 = vld [vmem:[%s6987_s2 + $0x300] sm:$0xff] }
  0xd7   : > { %5014 = vmatmul.mubr.f32.gmra.mxu0 %v6078_v0  ;;  %5048 = vmatpush3.msra.mxu1 %v4118_v26  ;;  %v2682_v0 = vld [vmem:[#allocation2 + $0x30] sm:$0xff]  ;;  %v7031_v26 = vld [vmem:[#allocation9_spill] sm:$0xff] }
  0xd8   : > { %5127 = vmatprep.subr.mxu0 %v4134_v6  ;;  %4936 = vmatprep.mubr.f32.mxu1 %v5811_v44  ;;  %v4164_v44 = vld [vmem:[%s6987_s2 + $0x3f8] sm:$0xff] }
  0xd9   : > { %5128 = vmatpush3.msra.mxu0 %v4134_v6  ;;  %4937 = vmatmul.mubr.f32.gmra.mxu1 %v5814_v48  ;;  %v4180_v48 = vld [vmem:[%s6987_s2 + $0x478] sm:$0xff] }
  0xda   : > { %5016 = vmatprep.mubr.f32.mxu0 %v6268_v38  ;;  %5049 = vmatprep.subr.mxu1 %v4117_v23 }
  0xdb   : > { %5017 = vmatmul.mubr.f32.gmra.mxu0 %v6274_v11  ;;  %5050 = vmatpush3.msra.mxu1 %v4117_v23  ;;  %v7033_v23 = vld [vmem:[#allocation11_spill] sm:$0xff] }
  0xdc   : > { %5129 = vmatprep.subr.mxu0 %v4133_v8  ;;  %5051 = vmatprep.mubr.f32.mxu1 %v5829_v57  ;;  %v2685_v57 = vld [vmem:[#allocation2 + $0x50] sm:$0xff] }
  0xdd   : > { %5130 = vmatpush3.msra.mxu0 %v4133_v8  ;;  %5052 = vmatmul.mubr.f32.vlgmr.msra.gmra.mxu1 %v5835_v59  ;;  %v4179_v59 = vld [vmem:[%s6987_s2 + $0x470] sm:$0xff] }
  0xde   : > { %5131 = vmatprep.mubr.f32.mxu0 %v2682_v0  ;;  %5179 = vmatprep.subr.mxu1 %v4164_v44  ;;  %v7034_v8 = vld [vmem:[#allocation12_spill] sm:$0xff] }
  0xdf   : > { %5132 = vmatmul.mubr.f32.vlgmr.msra.gmra.mxu0 %v2683_v13  ;;  %5180 = vmatpush3.msra.mxu1 %v4164_v44  ;;  %v4154_v44 = vld [vmem:[%s6987_s2 + $0x3a8] sm:$0xff] }
  0xe0   : > { %5259 = vmatprep.subr.mxu0 %v4180_v48  ;;  %5054 = vmatprep.mubr.f32.mxu1 %v5847_v63  ;;  %v2687_v63 = vld [vmem:[#allocation2 + $0x68] sm:$0xff] }
  0xe1   : > { %5260 = vmatpush3.msra.mxu0 %v4180_v48  ;;  %5055 = vmatmul.mubr.f32.gmra.mxu1 %v5853_v1  ;;  %v4178_v1 = vld [vmem:[%s6987_s2 + $0x468] sm:$0xff]  ;;  %v7035_v48 = vld [vmem:[#allocation13_spill] sm:$0xff] }
  0xe2   : > { %5134 = vmatprep.mubr.f32.mxu0 %v2684_v16  ;;  %5181 = vmatprep.subr.mxu1 %v4163_v19  ;;  %v7036_v16 = vld [vmem:[#allocation14_spill] sm:$0xff] }
  0xe3   : > { %5135 = vmatmul.mubr.f32.gmra.mxu0 %v2685_v57  ;;  %5182 = vmatpush3.msra.mxu1 %v4163_v19  ;;  %v4153_v57 = vld [vmem:[%s6987_s2 + $0x3a0] sm:$0xff] }
  0xe4   : > { %5261 = vmatprep.subr.mxu0 %v4179_v59  ;;  %5057 = vmatprep.mubr.f32.mxu1 %v5865_v5  ;;  %v2689_v5 = vld [vmem:[#allocation2 + $0x80] sm:$0xff] }
  0xe5   : > { %5262 = vmatpush3.msra.mxu0 %v4179_v59  ;;  %5058 = vmatmul.mubr.f32.gmra.mxu1 %v5871_v7  ;;  %v4177_v7 = vld [vmem:[%s6987_s2 + $0x460] sm:$0xff] }
  0xe6   : > { %5137 = vmatprep.mubr.f32.mxu0 %v2686_v21  ;;  %5183 = vmatprep.subr.mxu1 %v4162_v24 }
  0xe7   : > { %5138 = vmatmul.mubr.f32.gmra.mxu0 %v2687_v63  ;;  %5184 = vmatpush3.msra.mxu1 %v4162_v24  ;;  %v7037_v24 = vld [vmem:[#allocation15_spill] sm:$0xff]  ;;  %v2705_v63 = vld [vmem:[#allocation2 + $0x140] sm:$0xff] }
  0xe8   : > { %5263 = vmatprep.subr.mxu0 %v4178_v1  ;;  %5060 = vmatprep.mubr.f32.mxu1 %v5883_v12  ;;  %v2691_v12 = vld [vmem:[#allocation2 + $0x98] sm:$0xff] }
  0xe9   : > { %5264 = vmatpush3.msra.mxu0 %v4178_v1  ;;  %5061 = vmatmul.mubr.f32.gmra.mxu1 %v5889_v15  ;;  %v4176_v15 = vld [vmem:[%s6987_s2 + $0x458] sm:$0xff]  ;;  %v7038_v1 = vld [vmem:[#allocation16_spill] sm:$0xff] }
  0xea   : > { %5140 = vmatprep.mubr.f32.mxu0 %v2688_v27  ;;  %5185 = vmatprep.subr.mxu1 %v4161_v29  ;;  %v2706_v27 = vld [vmem:[#allocation2 + $0x150] sm:$0xff] }
  0xeb   : > { %5141 = vmatmul.mubr.f32.gmra.mxu0 %v2689_v5  ;;  %5186 = vmatpush3.msra.mxu1 %v4161_v29  ;;  %v4152_v29 = vld [vmem:[%s6987_s2 + $0x398] sm:$0xff] }
  0xec   : > { %5265 = vmatprep.subr.mxu0 %v4177_v7  ;;  %5063 = vmatprep.mubr.f32.mxu1 %v5901_v22 }
  0xed   : > { %5266 = vmatpush3.msra.mxu0 %v4177_v7  ;;  %5064 = vmatmul.mubr.f32.gmra.mxu1 %v5907_v25  ;;  %v2693_v25 = vld [vmem:[#allocation2 + $0xb0] sm:$0xff]  ;;  %v7039_v7 = vld [vmem:[#allocation17_spill] sm:$0xff] }
  0xee   : > { %5143 = vmatprep.mubr.f32.mxu0 %v2690_v32  ;;  %5187 = vmatprep.subr.mxu1 %v4160_v35  ;;  %v6322_v37 = vpop.f32.mrf.mxu1  ;;  %v2707_v32 = vld [vmem:[#allocation2 + $0x158] sm:$0xff] }
  0xef   : > { %5144 = vmatmul.mubr.f32.gmra.mxu0 %v2691_v12  ;;  %5188 = vmatpush3.msra.mxu1 %v4160_v35  ;;  %v6327_v22 = vpop.f32.mrf.mxu0  ;;  %v7040_v35 = vld [vmem:[#allocation18_spill] sm:$0xff]  ;;  %v4168_v12 = vld [vmem:[%s6987_s2 + $0x418] sm:$0xff] }
  0xf0   : > { %5267 = vmatprep.subr.mxu0 %v4176_v15  ;;  %5066 = vmatprep.mubr.f32.mxu1 %v5919_v31  ;;  %v6330_v62 = vpop.f32.mrf.mxu1  ;;  %v4158_v31 = vld [vmem:[%s6987_s2 + $0x3c8] sm:$0xff] }
  0xf1   : > { %5268 = vmatpush3.msra.mxu0 %v4176_v15  ;;  %5067 = vmatmul.mubr.f32.gmra.mxu1 %v7026_v3  ;;  %v6336_v18 = vpop.f32.mrf.mxu0 }
  0xf2   : > { %5146 = vmatprep.mubr.f32.mxu0 %v2692_v43  ;;  %5189 = vmatprep.subr.mxu1 %v4159_v45 }
  0xf3   : > { %5147 = vmatmul.mubr.f32.gmra.mxu0 %v2693_v25  ;;  %5190 = vmatpush3.msra.mxu1 %v4159_v45  ;;  %v6341_v30 = vpop.f32.mrf.mxu1  ;;  %v2708_v45 = vld [vmem:[#allocation2 + $0x168] sm:$0xff]  ;;  %v4151_v25 = vld [vmem:[%s6987_s2 + $0x390] sm:$0xff] }
  0xf4   : > { %5269 = vmatprep.subr.mxu0 %v4175_v10  ;;  %5069 = vmatprep.mubr.f32.mxu1 %v7027_v36  ;;  %v7042_v36 = vld [vmem:[#allocation20_spill] sm:$0xff] }
  0xf5   : > { %5270 = vmatpush3.msra.mxu0 %v4175_v10  ;;  %5070 = vmatmul.mubr.f32.gmra.mxu1 %v7028_v49  ;;  %v6348_v51 = vpop.f32.mrf.mxu0  ;;  %v6350_v58 = vpop.f32.mrf.mxu1  ;;  %v7041_v10 = vld [vmem:[#allocation19_spill] sm:$0xff]  ;;  %v4167_v49 = vld [vmem:[%s6987_s2 + $0x410] sm:$0xff] }
  0xf6   : > { %5149 = vmatprep.mubr.f32.mxu0 %v6171_v40  ;;  %5191 = vmatprep.subr.mxu1 %v4158_v31  ;;  %v4173_v40 = vld [vmem:[%s6987_s2 + $0x440] sm:$0xff] }
  0xf7   : > { %5150 = vmatmul.mubr.f32.gmra.mxu0 %v6174_v55  ;;  %5192 = vmatpush3.msra.mxu1 %v4158_v31  ;;  %v6357_v14 = vpop.f32.mrf.mxu0  ;;  %v4156_v55 = vld [vmem:[%s6987_s2 + $0x3b8] sm:$0xff]  ;;  %v2709_v31 = vld [vmem:[#allocation2 + $0x170] sm:$0xff] }
  0xf8   : > { %5271 = vmatprep.subr.mxu0 %v4174_v50  ;;  %5072 = vmatprep.mubr.f32.mxu1 %v7029_v17 }
  0xf9   : > { %5272 = vmatpush3.msra.mxu0 %v4174_v50  ;;  %5073 = vmatmul.mubr.f32.gmra.mxu1 %v7030_v33  ;;  %v6364_v42 = vpop.f32.mrf.mxu1 }
  0xfa   : > { %5152 = vmatprep.mubr.f32.mxu0 %v6185_v56  ;;  %5193 = vmatprep.subr.mxu1 %v4157_v60  ;;  %v4172_v56 = vld [vmem:[%s6987_s2 + $0x438] sm:$0xff] }
  0xfb   : > { %5153 = vmatmul.mubr.f32.gmra.mxu0 %v6188_v61  ;;  %5194 = vmatpush3.msra.mxu1 %v4157_v60  ;;  %v6371_v47 = vpop.f32.mrf.mxu0  ;;  %v6373_v2 = vpop.f32.mrf.mxu1  ;;  %v4150_v60 = vld [vmem:[%s6987_s2 + $0x388] sm:$0xff] }
  0xfc   : > { %5273 = vmatprep.subr.mxu0 %v4173_v40  ;;  %5075 = vmatprep.mubr.f32.mxu1 %v7031_v26  ;;  %v6468_v26 = vld [vmem:[#allocation2 + $0x182] sm:$0xff] }
  0xfd   : > { %5274 = vmatpush3.msra.mxu0 %v4173_v40  ;;  %5076 = vmatmul.mubr.f32.gmra.mxu1 %v7032_v54  ;;  %v6380_v61 = vpop.f32.mrf.mxu0  ;;  %v4166_v40 = vld [vmem:[%s6987_s2 + $0x408] sm:$0xff]  ;;  %v5404_v54 = vld [vmem:[#allocation2 + $0x180] sm:$0xff] }
  0xfe   : > { %5155 = vmatprep.mubr.f32.mxu0 %v6199_v4  ;;  %5195 = vmatprep.subr.mxu1 %v4156_v55  ;;  %v4171_v4 = vld [vmem:[%s6987_s2 + $0x430] sm:$0xff] }
  0xff   : > { %5156 = vmatmul.mubr.f32.gmra.mxu0 %v6202_v9  ;;  %5196 = vmatpush3.msra.mxu1 %v4156_v55  ;;  %v6387_v6 = vpop.f32.mrf.mxu1 }
 0x100   : > { %5275 = vmatprep.subr.mxu0 %v4172_v56  ;;  %5078 = vmatprep.mubr.f32.mxu1 %v7033_v23 }
 0x101   : > { %5276 = vmatpush3.msra.mxu0 %v4172_v56  ;;  %5079 = vmatmul.mubr.f32.gmra.mxu1 %v7034_v8  ;;  %v6394_v0 = vpop.f32.mrf.mxu0  ;;  %v6396_v9 = vpop.f32.mrf.mxu1  ;;  %v6470_v56 = vld [vmem:[#allocation2 + $0x18a] sm:$0xff] }
 0x102   : > { %5158 = vmatprep.mubr.f32.mxu0 %v6213_v20  ;;  %5197 = vmatprep.subr.mxu1 %v4155_v53  ;;  %v4170_v20 = vld [vmem:[%s6987_s2 + $0x428] sm:$0xff] }
 0x103   : > { %5159 = vmatmul.mubr.f32.gmra.mxu0 %v6216_v28  ;;  %5198 = vmatpush3.msra.mxu1 %v4155_v53  ;;  %v6403_v13 = vpop.f32.mrf.mxu0  ;;  %v2704_v28 = vld [vmem:[#allocation2 + $0x138] sm:$0xff]  ;;  %v5405_v53 = vld [vmem:[#allocation2 + $0x188] sm:$0xff] }
 0x104   : > { %5277 = vmatprep.subr.mxu0 %v4171_v4  ;;  %5081 = vmatprep.mubr.f32.mxu1 %v7035_v48  ;;  %v7043_v48 = vld [vmem:[#allocation21_spill] sm:$0xff] }
 0x105   : > { %5278 = vmatpush3.msra.mxu0 %v4171_v4  ;;  %5082 = vmatmul.mubr.f32.gmra.mxu1 %v7036_v16  ;;  %v6410_v19 = vpop.f32.mrf.mxu1  ;;  %v4165_v4 = vld [vmem:[%s6987_s2 + $0x400] sm:$0xff] }
 0x106   : > { %5161 = vmatprep.mubr.f32.mxu0 %v6227_v39  ;;  %5199 = vmatprep.subr.mxu1 %v4154_v44  ;;  %v4169_v39 = vld [vmem:[%s6987_s2 + $0x420] sm:$0xff] }
 0x107   : > { %5162 = vmatmul.mubr.f32.gmra.mxu0 %v6230_v46  ;;  %5200 = vmatpush3.msra.mxu1 %v4154_v44  ;;  %v6417_v59 = vpop.f32.mrf.mxu0  ;;  %v6419_v21 = vpop.f32.mrf.mxu1  ;;  %v3052_v44 = vld [vmem:[#allocation2 + $0x31] sm:$0xff]  ;;  %v3053_v16 = vld [vmem:[#allocation2 + $0x39] sm:$0xff] }
 0x108   : > { %5279 = vmatprep.subr.mxu0 %v4170_v20  ;;  %5084 = vmatprep.mubr.f32.mxu1 %v7037_v24  ;;  %v3423_v24 = vld [vmem:[#allocation2 + $0x3a] sm:$0xff] }
 0x109   : > { %5280 = vmatpush3.msra.mxu0 %v4170_v20  ;;  %5085 = vmatmul.mubr.f32.gmra.mxu1 %v7038_v1  ;;  %v6426_v46 = vpop.f32.mrf.mxu0  ;;  %v3424_v1 = vld [vmem:[#allocation2 + $0x4a] sm:$0xff] }
 0x10a   : > { %5164 = vmatprep.mubr.f32.mxu0 %v2704_v28  ;;  %5201 = vmatprep.subr.mxu1 %v4153_v57  ;;  %v3422_v28 = vld [vmem:[#allocation2 + $0x32] sm:$0xff] }
 0x10b   : > { %5165 = vmatmul.mubr.f32.gmra.mxu0 %v2705_v63  ;;  %5202 = vmatpush3.msra.mxu1 %v4153_v57  ;;  %v6431_v5 = vpop.f32.mrf.mxu1  ;;  %v3054_v57 = vld [vmem:[#allocation2 + $0x49] sm:$0xff] }
 0x10c   : > { %5281 = vmatprep.subr.mxu0 %v4169_v39  ;;  %5087 = vmatprep.mubr.f32.mxu1 %v7039_v7  ;;  %v3056_v7 = vld [vmem:[#allocation2 + $0x61] sm:$0xff] }
 0x10d   : > { %5282 = vmatpush3.msra.mxu0 %v4169_v39  ;;  %5088 = vmatmul.mubr.f32.gmra.mxu1 %v7040_v35  ;;  %v6438_v15 = vpop.f32.mrf.mxu0  ;;  %v6440_v43 = vpop.f32.mrf.mxu1 }
 0x10e   : > { %5167 = vmatprep.mubr.f32.mxu0 %v2706_v27  ;;  %5203 = vmatprep.subr.mxu1 %v4152_v29  ;;  %v3055_v27 = vld [vmem:[#allocation2 + $0x51] sm:$0xff] }
 0x10f   : > { %5168 = vmatmul.mubr.f32.gmra.mxu0 %v2707_v32  ;;  %5204 = vmatpush3.msra.mxu1 %v4152_v29  ;;  %v6445_v3 = vpop.f32.mrf.mxu0 }
 0x110   : > { %5283 = vmatprep.subr.mxu0 %v4168_v12  ;;  %5090 = vmatprep.mubr.f32.mxu1 %v7041_v10  ;;  %v3426_v10 = vld [vmem:[#allocation2 + $0x62] sm:$0xff] }
 0x111   : > { %5284 = vmatpush3.msra.mxu0 %v4168_v12  ;;  %5091 = vmatmul.mubr.f32.gmra.mxu1 %v7042_v36  ;;  %v6452_v50 = vpop.f32.mrf.mxu1  ;;  %v3425_v12 = vld [vmem:[#allocation2 + $0x52] sm:$0xff]  ;;  %v3057_v36 = vld [vmem:[#allocation2 + $0x69] sm:$0xff] }
 0x112   : > { %5170 = vmatprep.mubr.f32.mxu0 %v2708_v45  ;;  %5205 = vmatprep.subr.mxu1 %v4151_v25 }
 0x113   : > { %5171 = vmatmul.mubr.f32.gmra.mxu0 %v2709_v31  ;;  %5206 = vmatpush3.msra.mxu1 %v4151_v25  ;;  %v6457_v17 = vpop.f32.mrf.mxu0  ;;  %v6459_v33 = vpop.f32.mrf.mxu1 }
 0x114   : > { %5285 = vmatprep.subr.mxu0 %v4167_v49  ;;  %5093 = vmatprep.mubr.f32.mxu1 %v6081_v41 }
 0x115   : > { %5286 = vmatpush3.msra.mxu0 %v4167_v49  ;;  %5094 = vmatmul.mubr.f32.gmra.mxu1 %v6087_v34  ;;  %v6466_v55 = vpop.f32.mrf.mxu0  ;;  %v4149_v34 = vld [vmem:[%s6987_s2 + $0x380] sm:$0xff] }
 0x116   : > { %5173 = vmatprep.mubr.f32.mxu0 %v5404_v54  ;;  %5207 = vmatprep.subr.mxu1 %v4150_v60 }
 0x117   : > { %5174 = vmatmul.mubr.f32.gmra.mxu0 %v5405_v53  ;;  %5208 = vmatpush3.msra.mxu1 %v4150_v60  ;;  %v6472_v41 = vpop.f32.mrf.mxu1  ;;  %v3427_v53 = vld [vmem:[#allocation2 + $0x6a] sm:$0xff] }
 0x118   : > { %5287 = vmatprep.subr.mxu0 %v4166_v40  ;;  %5096 = vmatprep.mubr.f32.mxu1 %v6468_v26 }
 0x119   : > { %5288 = vmatpush3.msra.mxu0 %v4166_v40  ;;  %5097 = vmatmul.mubr.f32.gmra.mxu1 %v6470_v56  ;;  %v6479_v23 = vpop.f32.mrf.mxu0  ;;  %v6481_v8 = vpop.f32.mrf.mxu1  ;;  %v3058_v40 = vld [vmem:[#allocation2 + $0x79] sm:$0xff] }
 0x11a   : > { %5176 = vmatprep.mubr.f32.mxu0 %v7043_v48  ;;  %5209 = vmatprep.subr.mxu1 %v4149_v34 }
 0x11b   : > { %5177 = vmatmul.mubr.f32.gmra.mxu0 %v6099_v52  ;;  %5210 = vmatpush3.msra.mxu1 %v4149_v34  ;;  %v6488_v20 = vpop.f32.mrf.mxu0 }
 0x11c   : > { %5289 = vmatprep.subr.mxu0 %v4165_v4  ;;  %5211 = vmatprep.mubr.f32.mxu1 %v3052_v44  ;;  %v3428_v44 = vld [vmem:[#allocation2 + $0x7a] sm:$0xff] }
 0x11d   : > { %5290 = vmatpush3.msra.mxu0 %v4165_v4  ;;  %v4733_v63 = vpop.f32.mrf.mxu1  ;;  %5212 = vmatmul.mubr.f32.vlgmr.msra.gmra.mxu1 %v3053_v16  ;;  %v3059_v16 = vld [vmem:[#allocation2 + $0x81] sm:$0xff] }
 0x11e   : > { %v1137_v39 = vadd.f32 %v4733_v63, %v6327_v22  ;;  %5291 = vmatprep.mubr.f32.mxu0 %v3422_v28  ;;  %5214 = vmatprep.mubr.f32.mxu1 %v3054_v57 }
 0x11f   : > { %v4813_v29 = vpop.f32.mrf.mxu0  ;;  %5292 = vmatmul.mubr.f32.vlgmr.msra.gmra.mxu0 %v3423_v24  ;;  %v977_v52 = vpop.f32.mrf.mxu1  ;;  %v3060_v24 = vld [vmem:[#allocation2 + $0x91] sm:$0xff] }
 0x120   : > { %v6491_v32 = vadd.f32 %v4813_v29, %v1137_v39  ;;  %v1136_v35 = vadd.f32 %v977_v52, %v6336_v18  ;;  %5294 = vmatprep.mubr.f32.mxu0 %v3424_v1  ;;  %v3429_v1 = vld [vmem:[#allocation2 + $0x82] sm:$0xff]  ;;  %v3430_v29 = vld [vmem:[#allocation2 + $0x92] sm:$0xff] }
 0x121   : > { %v1347_v45 = vpop.f32.mrf.mxu0  ;;  %v4736_v25 = vpop.f32.mrf.mxu1  ;;  %5215 = vmatmul.mubr.f32.gmra.mxu1 %v3055_v27 }
 0x122   : > { %v6494_v31 = vadd.f32 %v1347_v45, %v1136_v35  ;;  %v1139_v22 = vadd.f32 %v4736_v25, %v6348_v51  ;;  %5217 = vmatprep.mubr.f32.mxu1 %v3056_v7  ;;  %v3061_v7 = vld [vmem:[#allocation2 + $0x99] sm:$0xff]  ;;  %v3062_v45 = vld [vmem:[#allocation2 + $0xa9] sm:$0xff] }
 0x123   : > { %v4816_v49 = vpop.f32.mrf.mxu0  ;;  %5295 = vmatmul.mubr.f32.gmra.mxu0 %v3425_v12  ;;  %v987_v60 = vpop.f32.mrf.mxu1 }
 0x124   : > { %v6497_v54 = vadd.f32 %v4816_v49, %v1139_v22  ;;  %v1138_v18 = vadd.f32 %v987_v60, %v6357_v14  ;;  %5297 = vmatprep.mubr.f32.mxu0 %v3426_v10  ;;  %v3431_v10 = vld [vmem:[#allocation2 + $0x9a] sm:$0xff]  ;;  %v3432_v49 = vld [vmem:[#allocation2 + $0xaa] sm:$0xff] }
 0x125   : > { %v1357_v34 = vpop.f32.mrf.mxu0  ;;  %v4739_v4 = vpop.f32.mrf.mxu1  ;;  %5218 = vmatmul.mubr.f32.gmra.mxu1 %v3057_v36 }
 0x126   : > { %v6500_v48 = vadd.f32 %v1357_v34, %v1138_v18  ;;  %v1141_v51 = vadd.f32 %v4739_v4, %v6371_v47  ;;  %5220 = vmatprep.mubr.f32.mxu1 %v3058_v40  ;;  %v3063_v40 = vld [vmem:[#allocation2 + $0xb1] sm:$0xff]  ;;  %v3064_v34 = vld [vmem:[#allocation2 + $0xc1] sm:$0xff] }
 0x127   : > { %v4819_v28 = vpop.f32.mrf.mxu0  ;;  %5298 = vmatmul.mubr.f32.gmra.mxu0 %v3427_v53  ;;  %v997_v57 = vpop.f32.mrf.mxu1 }
 0x128   : > { %v6503_v63 = vadd.f32 %v4819_v28, %v1141_v51  ;;  %v1140_v14 = vadd.f32 %v997_v57, %v6380_v61  ;;  %5300 = vmatprep.mubr.f32.mxu0 %v3428_v44  ;;  %v3433_v44 = vld [vmem:[#allocation2 + $0xb2] sm:$0xff]  ;;  %v3434_v28 = vld [vmem:[#allocation2 + $0xc2] sm:$0xff] }
 0x129   : > { %v1367_v39 = vpop.f32.mrf.mxu0  ;;  %v4742_v27 = vpop.f32.mrf.mxu1  ;;  %5221 = vmatmul.mubr.f32.gmra.mxu1 %v3059_v16 }
 0x12a   : > { %v6506_v52 = vadd.f32 %v1367_v39, %v1140_v14  ;;  %v1143_v47 = vadd.f32 %v4742_v27, %v6394_v0  ;;  %5223 = vmatprep.mubr.f32.mxu1 %v3060_v24  ;;  %v3065_v24 = vld [vmem:[#allocation2 + $0xc9] sm:$0xff]  ;;  %v3066_v39 = vld [vmem:[#allocation2 + $0xd9] sm:$0xff] }
 0x12b   : > { %v4822_v35 = vpop.f32.mrf.mxu0  ;;  %5301 = vmatmul.mubr.f32.gmra.mxu0 %v3429_v1  ;;  %v1007_v12 = vpop.f32.mrf.mxu1 }
 0x12c   : > { %v6509_v25 = vadd.f32 %v4822_v35, %v1143_v47  ;;  %v1142_v61 = vadd.f32 %v1007_v12, %v6403_v13  ;;  %5303 = vmatprep.mubr.f32.mxu0 %v3430_v29  ;;  %v3435_v29 = vld [vmem:[#allocation2 + $0xca] sm:$0xff]  ;;  %v3436_v35 = vld [vmem:[#allocation2 + $0xda] sm:$0xff] }
 0x12d   : > { %v1377_v22 = vpop.f32.mrf.mxu0  ;;  %v4745_v36 = vpop.f32.mrf.mxu1  ;;  %5224 = vmatmul.mubr.f32.gmra.mxu1 %v3061_v7 }
 0x12e   : > { %v6512_v60 = vadd.f32 %v1377_v22, %v1142_v61  ;;  %v1145_v0 = vadd.f32 %v4745_v36, %v6417_v59  ;;  %5226 = vmatprep.mubr.f32.mxu1 %v3062_v45  ;;  %v3067_v45 = vld [vmem:[#allocation2 + $0xe1] sm:$0xff]  ;;  %v3068_v22 = vld [vmem:[#allocation2 + $0xf1] sm:$0xff] }
 0x12f   : > { %v4825_v18 = vpop.f32.mrf.mxu0  ;;  %5304 = vmatmul.mubr.f32.gmra.mxu0 %v3431_v10  ;;  %v1017_v53 = vpop.f32.mrf.mxu1 }
 0x130   : > { %v6515_v4 = vadd.f32 %v4825_v18, %v1145_v0  ;;  %v1144_v13 = vadd.f32 %v1017_v53, %v6426_v46  ;;  %5306 = vmatprep.mubr.f32.mxu0 %v3432_v49  ;;  %v3437_v49 = vld [vmem:[#allocation2 + $0xe2] sm:$0xff]  ;;  %v3438_v18 = vld [vmem:[#allocation2 + $0xf2] sm:$0xff] }
 0x131   : > { %v1387_v51 = vpop.f32.mrf.mxu0  ;;  %v4748_v16 = vpop.f32.mrf.mxu1  ;;  %5227 = vmatmul.mubr.f32.gmra.mxu1 %v3063_v40 }
 0x132   : > { %v6518_v57 = vadd.f32 %v1387_v51, %v1144_v13  ;;  %v1147_v59 = vadd.f32 %v4748_v16, %v6438_v15  ;;  %5229 = vmatprep.mubr.f32.mxu1 %v3064_v34  ;;  %v3069_v34 = vld [vmem:[#allocation2 + $0xf9] sm:$0xff]  ;;  %v3070_v51 = vld [vmem:[#allocation2 + $0x109] sm:$0xff] }
 0x133   : > { %v4828_v14 = vpop.f32.mrf.mxu0  ;;  %5307 = vmatmul.mubr.f32.gmra.mxu0 %v3433_v44  ;;  %v1027_v1 = vpop.f32.mrf.mxu1 }
 0x134   : > { %v6521_v27 = vadd.f32 %v4828_v14, %v1147_v59  ;;  %v1146_v46 = vadd.f32 %v1027_v1, %v6445_v3  ;;  %5309 = vmatprep.mubr.f32.mxu0 %v3434_v28  ;;  %v3439_v28 = vld [vmem:[#allocation2 + $0xfa] sm:$0xff]  ;;  %v3440_v14 = vld [vmem:[#allocation2 + $0x10a] sm:$0xff] }
 0x135   : > { %v1397_v47 = vpop.f32.mrf.mxu0  ;;  %v4751_v7 = vpop.f32.mrf.mxu1  ;;  %5230 = vmatmul.mubr.f32.gmra.mxu1 %v3065_v24 }
 0x136   : > { %v6524_v12 = vadd.f32 %v1397_v47, %v1146_v46  ;;  %v1149_v15 = vadd.f32 %v4751_v7, %v6457_v17  ;;  %5232 = vmatprep.mubr.f32.mxu1 %v3066_v39  ;;  %v3071_v39 = vld [vmem:[#allocation2 + $0x111] sm:$0xff]  ;;  %v3072_v47 = vld [vmem:[#allocation2 + $0x121] sm:$0xff] }
 0x137   : > { %v4831_v61 = vpop.f32.mrf.mxu0  ;;  %5310 = vmatmul.mubr.f32.gmra.mxu0 %v3435_v29  ;;  %v1037_v10 = vpop.f32.mrf.mxu1 }
 0x138   : > { %v6527_v36 = vadd.f32 %v4831_v61, %v1149_v15  ;;  %v1148_v3 = vadd.f32 %v1037_v10, %v6466_v55  ;;  %5312 = vmatprep.mubr.f32.mxu0 %v3436_v35  ;;  %v3441_v35 = vld [vmem:[#allocation2 + $0x112] sm:$0xff]  ;;  %v3442_v61 = vld [vmem:[#allocation2 + $0x122] sm:$0xff] }
 0x139   : > { %v1407_v0 = vpop.f32.mrf.mxu0  ;;  %v4754_v40 = vpop.f32.mrf.mxu1  ;;  %5233 = vmatmul.mubr.f32.gmra.mxu1 %v3067_v45 }
 0x13a   : > { %v6530_v53 = vadd.f32 %v1407_v0, %v1148_v3  ;;  %v1151_v17 = vadd.f32 %v4754_v40, %v6479_v23  ;;  %5235 = vmatprep.mubr.f32.mxu1 %v3068_v22  ;;  %v3073_v22 = vld [vmem:[#allocation2 + $0x129] sm:$0xff]  ;;  %v3074_v0 = vld [vmem:[#allocation2 + $0x139] sm:$0xff] }
 0x13b   : > { %v4834_v13 = vpop.f32.mrf.mxu0  ;;  %5313 = vmatmul.mubr.f32.gmra.mxu0 %v3437_v49  ;;  %v1047_v44 = vpop.f32.mrf.mxu1 }
 0x13c   : > { %v6533_v16 = vadd.f32 %v4834_v13, %v1151_v17  ;;  %v1150_v55 = vadd.f32 %v1047_v44, %v6488_v20  ;;  %5315 = vmatprep.mubr.f32.mxu0 %v3438_v18  ;;  %v3443_v18 = vld [vmem:[#allocation2 + $0x12a] sm:$0xff]  ;;  %v3444_v13 = vld [vmem:[#allocation2 + $0x13a] sm:$0xff] }
 0x13d   : > { %v1417_v59 = vpop.f32.mrf.mxu0  ;;  %v4757_v24 = vpop.f32.mrf.mxu1  ;;  %5236 = vmatmul.mubr.f32.gmra.mxu1 %v3069_v34 }
 0x13e   : > { %v6536_v1 = vadd.f32 %v1417_v59, %v1150_v55  ;;  %v1153_v23 = vadd.f32 %v4757_v24, %v6322_v37  ;;  %5238 = vmatprep.mubr.f32.mxu1 %v3070_v51  ;;  %v3075_v51 = vld [vmem:[#allocation2 + $0x141] sm:$0xff]  ;;  %v3076_v59 = vld [vmem:[#allocation2 + $0x151] sm:$0xff] }
 0x13f   : > { %v4837_v46 = vpop.f32.mrf.mxu0  ;;  %5316 = vmatmul.mubr.f32.gmra.mxu0 %v3439_v28  ;;  %v1057_v29 = vpop.f32.mrf.mxu1 }
 0x140   : > { %v6539_v7 = vadd.f32 %v4837_v46, %v1153_v23  ;;  %v1152_v20 = vadd.f32 %v1057_v29, %v6330_v62  ;;  %5318 = vmatprep.mubr.f32.mxu0 %v3440_v14  ;;  %v3445_v14 = vld [vmem:[#allocation2 + $0x142] sm:$0xff]  ;;  %v3446_v46 = vld [vmem:[#allocation2 + $0x152] sm:$0xff] }
 0x141   : > { %v1427_v15 = vpop.f32.mrf.mxu0  ;;  %v4760_v45 = vpop.f32.mrf.mxu1  ;;  %5239 = vmatmul.mubr.f32.gmra.mxu1 %v3071_v39 }
 0x142   : > { %v6542_v10 = vadd.f32 %v1427_v15, %v1152_v20  ;;  %v1155_v37 = vadd.f32 %v4760_v45, %v6341_v30  ;;  %5241 = vmatprep.mubr.f32.mxu1 %v3072_v47  ;;  %v3077_v47 = vld [vmem:[#allocation2 + $0x159] sm:$0xff]  ;;  %v3078_v15 = vld [vmem:[#allocation2 + $0x169] sm:$0xff] }
 0x143   : > { %v4840_v3 = vpop.f32.mrf.mxu0  ;;  %5319 = vmatmul.mubr.f32.gmra.mxu0 %v3441_v35  ;;  %v1067_v49 = vpop.f32.mrf.mxu1 }
 0x144   : > { %v6545_v40 = vadd.f32 %v4840_v3, %v1155_v37  ;;  %v1154_v62 = vadd.f32 %v1067_v49, %v6350_v58  ;;  %5321 = vmatprep.mubr.f32.mxu0 %v3442_v61  ;;  %v3447_v61 = vld [vmem:[#allocation2 + $0x15a] sm:$0xff]  ;;  %v3448_v3 = vld [vmem:[#allocation2 + $0x16a] sm:$0xff] }
 0x145   : > { %v1437_v17 = vpop.f32.mrf.mxu0  ;;  %v4763_v34 = vpop.f32.mrf.mxu1  ;;  %5242 = vmatmul.mubr.f32.gmra.mxu1 %v3073_v22 }
 0x146   : > { %v6548_v44 = vadd.f32 %v1437_v17, %v1154_v62  ;;  %v1157_v30 = vadd.f32 %v4763_v34, %v6364_v42  ;;  %5244 = vmatprep.mubr.f32.mxu1 %v3074_v0  ;;  %v3079_v0 = vld [vmem:[#allocation2 + $0x171] sm:$0xff] }
 0x147   : > { %v4843_v55 = vpop.f32.mrf.mxu0  ;;  %5322 = vmatmul.mubr.f32.gmra.mxu0 %v3443_v18  ;;  %v1077_v28 = vpop.f32.mrf.mxu1 }
 0x148   : > { %v6551_v24 = vadd.f32 %v4843_v55, %v1157_v30  ;;  %v1156_v58 = vadd.f32 %v1077_v28, %v6373_v2  ;;  %5324 = vmatprep.mubr.f32.mxu0 %v3444_v13 }
 0x149   : > { %v1447_v23 = vpop.f32.mrf.mxu0  ;;  %v4766_v39 = vpop.f32.mrf.mxu1  ;;  %5245 = vmatmul.mubr.f32.gmra.mxu1 %v3075_v51 }
 0x14a   : > { %v6554_v29 = vadd.f32 %v1447_v23, %v1156_v58  ;;  %v1159_v42 = vadd.f32 %v4766_v39, %v6387_v6  ;;  %5247 = vmatprep.mubr.f32.mxu1 %v3076_v59  ;;  %v3082_v59 = vld [vmem:[#allocation2 + $0x199] sm:$0xff] }
 0x14b   : > { %v4846_v20 = vpop.f32.mrf.mxu0  ;;  %5325 = vmatmul.mubr.f32.gmra.mxu0 %v3445_v14  ;;  %v1087_v35 = vpop.f32.mrf.mxu1  ;;  %v3452_v39 = vld [vmem:[#allocation2 + $0x19a] sm:$0xff] }
 0x14c   : > { %v6557_v45 = vadd.f32 %v4846_v20, %v1159_v42  ;;  %v1158_v2 = vadd.f32 %v1087_v35, %v6396_v9  ;;  %5327 = vmatprep.mubr.f32.mxu0 %v3446_v46  ;;  %v3449_v9 = vld [vmem:[#allocation2 + $0x172] sm:$0xff] }
 0x14d   : > { %v1457_v37 = vpop.f32.mrf.mxu0  ;;  %v4769_v22 = vpop.f32.mrf.mxu1  ;;  %5248 = vmatmul.mubr.f32.gmra.mxu1 %v3077_v47 }
 0x14e   : > { %v6560_v49 = vadd.f32 %v1457_v37, %v1158_v2  ;;  %v1161_v6 = vadd.f32 %v4769_v22, %v6410_v19  ;;  %5250 = vmatprep.mubr.f32.mxu1 %v3078_v15 }
 0x14f   : > { %v4849_v62 = vpop.f32.mrf.mxu0  ;;  %5328 = vmatmul.mubr.f32.gmra.mxu0 %v3447_v61  ;;  %v1097_v18 = vpop.f32.mrf.mxu1 }
 0x150   : > { %v6563_v17 = vadd.f32 %v4849_v62, %v1161_v6  ;;  %v1160_v34 = vadd.f32 %v1097_v18, %v6419_v21  ;;  %5330 = vmatprep.mubr.f32.mxu0 %v3448_v3 }
 0x151   : > { %v1467_v13 = vpop.f32.mrf.mxu0  ;;  %v4772_v30 = vpop.f32.mrf.mxu1  ;;  %5251 = vmatmul.mubr.f32.gmra.mxu1 %v3079_v0 }
 0x152   : > { %v6566_v51 = vadd.f32 %v1467_v13, %v1160_v34  ;;  %v1163_v55 = vadd.f32 %v4772_v30, %v6431_v5  ;;  %5253 = vmatprep.mubr.f32.mxu1 %v6268_v38  ;;  %v3083_v38 = vld [vmem:[#allocation2 + $0x1a1] sm:$0xff] }
 0x153   : > { %v4852_v19 = vpop.f32.mrf.mxu0  ;;  %5331 = vmatmul.mubr.f32.gmra.mxu0 %v3449_v9  ;;  %v1107_v28 = vpop.f32.mrf.mxu1 }
 0x154   : > { %v6570_v58 = vadd.f32 %v4852_v19, %v1163_v55  ;;  %v1162_v14 = vadd.f32 %v1107_v28, %v6440_v43  ;;  %5333 = vmatprep.mubr.f32.mxu0 %v6468_v26  ;;  %v3453_v26 = vld [vmem:[#allocation2 + $0x1a2] sm:$0xff] }
 0x155   : > { %v1477_v21 = vpop.f32.mrf.mxu0  ;;  %v4775_v23 = vpop.f32.mrf.mxu1  ;;  %5254 = vmatmul.mubr.f32.gmra.mxu1 %v6274_v11 }
 0x156   : > { %v6575_v46 = vadd.f32 %v1477_v21, %v1162_v14  ;;  %v1165_v5 = vadd.f32 %v4775_v23, %v6452_v50  ;;  %5256 = vmatprep.mubr.f32.mxu1 %v3082_v59 }
 0x157   : > { %v4855_v42 = vpop.f32.mrf.mxu0  ;;  %5334 = vmatmul.mubr.f32.gmra.mxu0 %v6470_v56  ;;  %v1117_v47 = vpop.f32.mrf.mxu1 }
 0x158   : > { %v6579_v20 = vadd.f32 %v4855_v42, %v1165_v5  ;;  %v1164_v43 = vadd.f32 %v1117_v47, %v6459_v33  ;;  %5336 = vmatprep.mubr.f32.mxu0 %v3452_v39 }
 0x159   : > { %v1487_v35 = vpop.f32.mrf.mxu0  ;;  %v4778_v15 = vpop.f32.mrf.mxu1  ;;  %5257 = vmatmul.mubr.f32.gmra.mxu1 %v3083_v38 }
 0x15a   : > { %v6582_v11 = vadd.f32 %v1487_v35, %v1164_v43  ;;  %v1167_v2 = vadd.f32 %v4778_v15, %v6472_v41 }
 0x15b   : > { %v4858_v50 = vpop.f32.mrf.mxu0  ;;  %5337 = vmatmul.mubr.f32.gmra.mxu0 %v3453_v26  ;;  %v1127_v61 = vpop.f32.mrf.mxu1 }
 0x15c   : > { %v6585_v37 = vadd.f32 %v4858_v50, %v1167_v2  ;;  %v1166_v56 = vadd.f32 %v1127_v61, %v6481_v8 }
 0x15d   : > { %v1497_v22 = vpop.f32.mrf.mxu0  ;;  %v4893_v3 = vpop.f32.mrf.mxu1 }
 0x15e   : > { %v6588_v6 = vadd.f32 %v1497_v22, %v1166_v56  ;;  %v1878_v33 = vadd.f32 %v4893_v3, %v6491_v32 }
 0x15f   : > { %v4973_v0 = vpop.f32.mrf.mxu0  ;;  %v1718_v62 = vpop.f32.mrf.mxu1 }
 0x160   : > { %v6591_v18 = vadd.f32 %v4973_v0, %v1878_v33  ;;  %v1877_v34 = vadd.f32 %v1718_v62, %v6494_v31 }
 0x161   : > { %v2088_v41 = vpop.f32.mrf.mxu0  ;;  %v4896_v9 = vpop.f32.mrf.mxu1 }
 0x162   : > { %v6594_v13 = vadd.f32 %v2088_v41, %v1877_v34  ;;  %v1880_v30 = vadd.f32 %v4896_v9, %v6497_v54 }
 0x163   : > { %v4976_v55 = vpop.f32.mrf.mxu0  ;;  %v1728_v8 = vpop.f32.mrf.mxu1 }
 0x164   : > { %v6597_v19 = vadd.f32 %v4976_v55, %v1880_v30  ;;  %v1879_v28 = vadd.f32 %v1728_v8, %v6500_v48 }
 0x165   : > { %v2098_v59 = vpop.f32.mrf.mxu0  ;;  %v4899_v32 = vpop.f32.mrf.mxu1 }
 0x166   : > { %v6600_v14 = vadd.f32 %v2098_v59, %v1879_v28  ;;  %v1882_v21 = vadd.f32 %v4899_v32, %v6503_v63 }
 0x167   : > { %v4979_v23 = vpop.f32.mrf.mxu0  ;;  %v1738_v31 = vpop.f32.mrf.mxu1 }
 0x168   : > { %v6603_v39 = vadd.f32 %v4979_v23, %v1882_v21  ;;  %v1881_v5 = vadd.f32 %v1738_v31, %v6506_v52 }
 0x169   : > { %v2108_v38 = vpop.f32.mrf.mxu0  ;;  %v4902_v54 = vpop.f32.mrf.mxu1 }
 0x16a   : > { %v6606_v42 = vadd.f32 %v2108_v38, %v1881_v5  ;;  %v1884_v47 = vadd.f32 %v4902_v54, %v6509_v25 }
 0x16b   : > { %v4982_v43 = vpop.f32.mrf.mxu0  ;;  %v1748_v48 = vpop.f32.mrf.mxu1 }
 0x16c   : > { %v6609_v26 = vadd.f32 %v4982_v43, %v1884_v47  ;;  %v1883_v35 = vadd.f32 %v1748_v48, %v6512_v60 }
 0x16d   : > { %v2118_v15 = vpop.f32.mrf.mxu0  ;;  %v4905_v63 = vpop.f32.mrf.mxu1 }
 0x16e   : > { %v6612_v2 = vadd.f32 %v2118_v15, %v1883_v35  ;;  %v1886_v50 = vadd.f32 %v4905_v63, %v6515_v4 }
 0x16f   : > { %v4985_v61 = vpop.f32.mrf.mxu0  ;;  %v1758_v52 = vpop.f32.mrf.mxu1 }
 0x170   : > { %v6615_v56 = vadd.f32 %v4985_v61, %v1886_v50  ;;  %v1885_v22 = vadd.f32 %v1758_v52, %v6518_v57 }
 0x171   : > { %v2128_v3 = vpop.f32.mrf.mxu0  ;;  %v4908_v25 = vpop.f32.mrf.mxu1 }
 0x172   : > { %v6618_v33 = vadd.f32 %v2128_v3, %v1885_v22  ;;  %v1888_v0 = vadd.f32 %v4908_v25, %v6521_v27 }
 0x173   : > { %v4988_v62 = vpop.f32.mrf.mxu0  ;;  %v1768_v60 = vpop.f32.mrf.mxu1 }
 0x174   : > { %v6621_v34 = vadd.f32 %v4988_v62, %v1888_v0  ;;  %v1887_v41 = vadd.f32 %v1768_v60, %v6524_v12 }
 0x175   : > { %v2138_v9 = vpop.f32.mrf.mxu0  ;;  %v4911_v4 = vpop.f32.mrf.mxu1 }
 0x176   : > { %v6624_v30 = vadd.f32 %v2138_v9, %v1887_v41  ;;  %v1890_v55 = vadd.f32 %v4911_v4, %v6527_v36 }
 0x177   : > { %v4991_v8 = vpop.f32.mrf.mxu0  ;;  %v1778_v57 = vpop.f32.mrf.mxu1 }
 0x178   : > { %v6627_v28 = vadd.f32 %v4991_v8, %v1890_v55  ;;  %v1889_v59 = vadd.f32 %v1778_v57, %v6530_v53 }
 0x179   : > { %v2148_v32 = vpop.f32.mrf.mxu0  ;;  %v4914_v27 = vpop.f32.mrf.mxu1 }
 0x17a   : > { %v6630_v21 = vadd.f32 %v2148_v32, %v1889_v59  ;;  %v1892_v23 = vadd.f32 %v4914_v27, %v6533_v16 }
 0x17b   : > { %v4994_v31 = vpop.f32.mrf.mxu0  ;;  %v1788_v12 = vpop.f32.mrf.mxu1 }
 0x17c   : > { %v6633_v5 = vadd.f32 %v4994_v31, %v1892_v23  ;;  %v1891_v38 = vadd.f32 %v1788_v12, %v6536_v1 }
 0x17d   : > { %v2158_v54 = vpop.f32.mrf.mxu0  ;;  %v4917_v36 = vpop.f32.mrf.mxu1 }
 0x17e   : > { %v6636_v47 = vadd.f32 %v2158_v54, %v1891_v38  ;;  %v1894_v43 = vadd.f32 %v4917_v36, %v6539_v7 }
 0x17f   : > { %v4997_v48 = vpop.f32.mrf.mxu0  ;;  %v1798_v53 = vpop.f32.mrf.mxu1 }
 0x180   : > { %v6639_v35 = vadd.f32 %v4997_v48, %v1894_v43  ;;  %v1893_v15 = vadd.f32 %v1798_v53, %v6542_v10 }
 0x181   : > { %v2168_v63 = vpop.f32.mrf.mxu0  ;;  %v4920_v16 = vpop.f32.mrf.mxu1 }
 0x182   : > { %v6642_v50 = vadd.f32 %v2168_v63, %v1893_v15  ;;  %v1896_v61 = vadd.f32 %v4920_v16, %v6545_v40 }
 0x183   : > { %v5000_v52 = vpop.f32.mrf.mxu0  ;;  %v1808_v1 = vpop.f32.mrf.mxu1 }
 0x184   : > { %v6645_v22 = vadd.f32 %v5000_v52, %v1896_v61  ;;  %v1895_v3 = vadd.f32 %v1808_v1, %v6548_v44 }
 0x185   : > { %v2178_v25 = vpop.f32.mrf.mxu0  ;;  %v4923_v7 = vpop.f32.mrf.mxu1 }
 0x186   : > { %7044 = vst [vmem:[#allocation4_spill] sm:$0xff] %v6645_v22  ;;  %v6648_v0 = vadd.f32 %v2178_v25, %v1895_v3  ;;  %v1898_v62 = vadd.f32 %v4923_v7, %v6551_v24 }
 0x187   : > { %v5003_v60 = vpop.f32.mrf.mxu0  ;;  %v1818_v10 = vpop.f32.mrf.mxu1 }
 0x188   : > { %7045 = vst [vmem:[#allocation5_spill] sm:$0xff] %v6648_v0  ;;  %v6651_v41 = vadd.f32 %v5003_v60, %v1898_v62  ;;  %v1897_v9 = vadd.f32 %v1818_v10, %v6554_v29 }
 0x189   : > { %v2188_v4 = vpop.f32.mrf.mxu0  ;;  %v4926_v40 = vpop.f32.mrf.mxu1 }
 0x18a   : > { %7046 = vst [vmem:[#allocation6_spill] sm:$0xff] %v6651_v41  ;;  %v6654_v55 = vadd.f32 %v2188_v4, %v1897_v9  ;;  %v1900_v8 = vadd.f32 %v4926_v40, %v6557_v45 }
 0x18b   : > { %v5006_v57 = vpop.f32.mrf.mxu0  ;;  %v1828_v44 = vpop.f32.mrf.mxu1 }
 0x18c   : > { %7047 = vst [vmem:[#allocation7_spill] sm:$0xff] %v6654_v55  ;;  %v6657_v59 = vadd.f32 %v5006_v57, %v1900_v8  ;;  %v1899_v32 = vadd.f32 %v1828_v44, %v6560_v49 }
 0x18d   : > { %v2198_v27 = vpop.f32.mrf.mxu0  ;;  %v4929_v24 = vpop.f32.mrf.mxu1 }
 0x18e   : > { %7048 = vst [vmem:[#allocation8_spill] sm:$0xff] %v6657_v59  ;;  %v6660_v23 = vadd.f32 %v2198_v27, %v1899_v32  ;;  %v1902_v31 = vadd.f32 %v4929_v24, %v6563_v17 }
 0x18f   : > { %v5009_v12 = vpop.f32.mrf.mxu0  ;;  %v1838_v29 = vpop.f32.mrf.mxu1 }
 0x190   : > { %7049 = vst [vmem:[#allocation9_spill] sm:$0xff] %v6660_v23  ;;  %v6663_v38 = vadd.f32 %v5009_v12, %v1902_v31  ;;  %v1901_v54 = vadd.f32 %v1838_v29, %v6566_v51 }
 0x191   : > { %v2208_v36 = vpop.f32.mrf.mxu0  ;;  %v4932_v45 = vpop.f32.mrf.mxu1 }
 0x192   : > { %7050 = vst [vmem:[#allocation10_spill] sm:$0xff] %v6663_v38  ;;  %v6666_v43 = vadd.f32 %v2208_v36, %v1901_v54  ;;  %v1904_v48 = vadd.f32 %v4932_v45, %v6570_v58 }
 0x193   : > { %v5012_v53 = vpop.f32.mrf.mxu0  ;;  %v1848_v49 = vpop.f32.mrf.mxu1 }
 0x194   : > { %7051 = vst [vmem:[#allocation11_spill] sm:$0xff] %v6666_v43  ;;  %v6669_v15 = vadd.f32 %v5012_v53, %v1904_v48  ;;  %v1903_v63 = vadd.f32 %v1848_v49, %v6575_v46 }
 0x195   : > { %v2218_v16 = vpop.f32.mrf.mxu0  ;;  %v4935_v17 = vpop.f32.mrf.mxu1 }
 0x196   : > { %7052 = vst [vmem:[#allocation12_spill] sm:$0xff] %v6669_v15  ;;  %v6672_v61 = vadd.f32 %v2218_v16, %v1903_v63  ;;  %v1906_v52 = vadd.f32 %v4935_v17, %v6579_v20 }
 0x197   : > { %v5015_v1 = vpop.f32.mrf.mxu0  ;;  %v1858_v51 = vpop.f32.mrf.mxu1 }
 0x198   : > { %7053 = vst [vmem:[#allocation13_spill] sm:$0xff] %v6672_v61  ;;  %v6675_v3 = vadd.f32 %v5015_v1, %v1906_v52  ;;  %v1905_v25 = vadd.f32 %v1858_v51, %v6582_v11 }
 0x199   : > { %v2228_v7 = vpop.f32.mrf.mxu0  ;;  %v4938_v58 = vpop.f32.mrf.mxu1 }
 0x19a   : > { %7054 = vst [vmem:[#allocation14_spill] sm:$0xff] %v6675_v3  ;;  %v6678_v62 = vadd.f32 %v2228_v7, %v1905_v25  ;;  %v1908_v60 = vadd.f32 %v4938_v58, %v6585_v37 }
 0x19b   : > { %v5018_v10 = vpop.f32.mrf.mxu0  ;;  %v1868_v46 = vpop.f32.mrf.mxu1 }
 0x19c   : > { %7055 = vst [vmem:[#allocation15_spill] sm:$0xff] %v6678_v62  ;;  %v6681_v9 = vadd.f32 %v5018_v10, %v1908_v60  ;;  %v1907_v4 = vadd.f32 %v1868_v46, %v6588_v6 }
 0x19d   : > { %v2238_v40 = vpop.f32.mrf.mxu0  ;;  %v5053_v20 = vpop.f32.mrf.mxu1 }
 0x19e   : > { %7056 = vst [vmem:[#allocation16_spill] sm:$0xff] %v6681_v9  ;;  %v6684_v8 = vadd.f32 %v2238_v40, %v1907_v4 }
 0x19f   : > { %v6686_v57 = vpop.f32.mrf.mxu0  ;;  %v2458_v44 = vpop.f32.mrf.mxu1 }
 0x1a0   : > { %7057 = vst [vmem:[#allocation17_spill] sm:$0xff] %v6684_v8 }
 0x1a1   : > { %v6688_v11 = vpop.f32.mrf.mxu0  ;;  %v5056_v32 = vpop.f32.mrf.mxu1 }
 0x1a3   : > { %v6690_v27 = vpop.f32.mrf.mxu0  ;;  %v6692_v24 = vpop.f32.mrf.mxu1 }
 0x1a5   : > { %v6694_v37 = vpop.f32.mrf.mxu0  ;;  %v6696_v31 = vpop.f32.mrf.mxu1 }
 0x1a7   : > { %v6698_v12 = vpop.f32.mrf.mxu0  ;;  %v6700_v6 = vpop.f32.mrf.mxu1 }
 0x1a9   : > { %v6702_v29 = vpop.f32.mrf.mxu0  ;;  %v6704_v54 = vpop.f32.mrf.mxu1 }
 0x1ab   : > { %v6706_v36 = vpop.f32.mrf.mxu0  ;;  %v6708_v45 = vpop.f32.mrf.mxu1 }
 0x1ad   : > { %v6710_v48 = vpop.f32.mrf.mxu0  ;;  %v6712_v53 = vpop.f32.mrf.mxu1 }
 0x1af   : > { %v6714_v49 = vpop.f32.mrf.mxu0  ;;  %v6716_v63 = vpop.f32.mrf.mxu1 }
 0x1b1   : > { %v6718_v16 = vpop.f32.mrf.mxu0  ;;  %v6720_v17 = vpop.f32.mrf.mxu1 }
 0x1b3   : > { %v6722_v52 = vpop.f32.mrf.mxu0  ;;  %v6724_v1 = vpop.f32.mrf.mxu1 }
 0x1b5   : > { %v6726_v51 = vpop.f32.mrf.mxu0  ;;  %v6728_v25 = vpop.f32.mrf.mxu1 }
 0x1b7   : > { %v6730_v7 = vpop.f32.mrf.mxu0  ;;  %v6732_v58 = vpop.f32.mrf.mxu1 }
 0x1b9   : > { %v6734_v60 = vpop.f32.mrf.mxu0  ;;  %v6736_v10 = vpop.f32.mrf.mxu1 }
 0x1bb   : > { %v6738_v46 = vpop.f32.mrf.mxu0  ;;  %v6740_v4 = vpop.f32.mrf.mxu1 }
 0x1bd   : > { %v6742_v40 = vpop.f32.mrf.mxu0  ;;  %v6744_v8 = vpop.f32.mrf.mxu1 }
 0x1bf   : > { %v6746_v9 = vpop.f32.mrf.mxu0  ;;  %v6748_v62 = vpop.f32.mrf.mxu1 }
 0x1c1   : > { %v6750_v3 = vpop.f32.mrf.mxu0  ;;  %v6752_v61 = vpop.f32.mrf.mxu1 }
 0x1c2   : > { %7058 = vst [vmem:[#allocation18_spill] sm:$0xff] %v6750_v3  ;;  %7059 = vst [vmem:[#allocation19_spill] sm:$0xff] %v6752_v61 }
 0x1c3   : > { %v6754_v15 = vpop.f32.mrf.mxu0  ;;  %v6756_v43 = vpop.f32.mrf.mxu1 }
 0x1c4   : > { %7060 = vst [vmem:[#allocation20_spill] sm:$0xff] %v6754_v15  ;;  %7061 = vst [vmem:[#allocation21_spill] sm:$0xff] %v6756_v43 }
 0x1c5   : > { %v6758_v38 = vpop.f32.mrf.mxu0  ;;  %v6760_v23 = vpop.f32.mrf.mxu1 }
 0x1c6   : > { %7062 = vst [vmem:[#allocation22_spill] sm:$0xff] %v6758_v38  ;;  %7063 = vst [vmem:[#allocation23_spill] sm:$0xff] %v6760_v23 }
 0x1c7   : > { %v6762_v59 = vpop.f32.mrf.mxu0  ;;  %v6764_v55 = vpop.f32.mrf.mxu1 }
 0x1c8   : > { %7064 = vst [vmem:[#allocation24_spill] sm:$0xff] %v6762_v59  ;;  %7065 = vst [vmem:[#allocation25_spill] sm:$0xff] %v6764_v55 }
 0x1c9   : > { %v6766_v41 = vpop.f32.mrf.mxu0  ;;  %v6768_v0 = vpop.f32.mrf.mxu1 }
 0x1ca   : > { %7066 = vst [vmem:[#allocation26_spill] sm:$0xff] %v6766_v41  ;;  %7067 = vst [vmem:[#allocation27_spill] sm:$0xff] %v6768_v0 }
 0x1cb   : > { %v6770_v22 = vpop.f32.mrf.mxu0  ;;  %v6772_v3 = vpop.f32.mrf.mxu1 }
 0x1cc   : > { %7068 = vst [vmem:[#allocation28_spill] sm:$0xff] %v6770_v22  ;;  %7069 = vst [vmem:[#allocation29_spill] sm:$0xff] %v6772_v3 }
 0x1cd   : > { %v6774_v61 = vpop.f32.mrf.mxu0  ;;  %v6776_v15 = vpop.f32.mrf.mxu1 }
 0x1ce   : > { %7070 = vst [vmem:[#allocation30_spill] sm:$0xff] %v6774_v61  ;;  %7071 = vst [vmem:[#allocation31_spill] sm:$0xff] %v6776_v15 }
 0x1cf   : > { %v6778_v43 = vpop.f32.mrf.mxu0  ;;  %v6780_v38 = vpop.f32.mrf.mxu1 }
 0x1d0   : > { %7072 = vst [vmem:[#allocation32_spill] sm:$0xff] %v6778_v43  ;;  %7073 = vst [vmem:[#allocation33_spill] sm:$0xff] %v6780_v38  ;;  %v2618_v43 = vadd.f32 %v5053_v20, %v6591_v18  ;;  %v2619_v20 = vadd.f32 %v6692_v24, %v6600_v14 }
 0x1d1   : > { %v6782_v23 = vpop.f32.mrf.mxu0  ;;  %v6784_v59 = vpop.f32.mrf.mxu1 }
 0x1d2   : > { %7074 = vst [vmem:[#allocation34_spill] sm:$0xff] %v6782_v23  ;;  %v2617_v23 = vadd.f32 %v2458_v44, %v6594_v13  ;;  %v2622_v13 = vadd.f32 %v6696_v31, %v6603_v39 }
 0x1d3   : > { %v6786_v55 = vpop.f32.mrf.mxu0  ;;  %v6788_v41 = vpop.f32.mrf.mxu1 }
 0x1d4   : > { %7075 = vst [vmem:[#allocation35_spill] sm:$0xff] %v6786_v55  ;;  %7076 = vst [vmem:[#allocation36_spill] sm:$0xff] %v6788_v41  ;;  %v2988_v18 = vadd.f32 %v6688_v11, %v2617_v23  ;;  %v2621_v23 = vadd.f32 %v6700_v6, %v6606_v42  ;;  %v2993_v31 = vadd.f32 %v6698_v12, %v2622_v13 }
 0x1d5   : > { %v6790_v0 = vpop.f32.mrf.mxu0  ;;  %v6792_v22 = vpop.f32.mrf.mxu1  ;;  %v2623_v12 = vadd.f32 %v6708_v45, %v6612_v2 }
 0x1d6   : > { %7077 = vst [vmem:[#allocation37_spill] sm:$0xff] %v6790_v0  ;;  %7078 = vst [vmem:[#allocation38_spill] sm:$0xff] %v6792_v22  ;;  %v2989_v0 = vadd.f32 %v6686_v57, %v2618_v43  ;;  %v2620_v22 = vadd.f32 %v5056_v32, %v6597_v19 }
 0x1d7   : > { %v6794_v3 = vpop.f32.mrf.mxu0  ;;  %v6796_v61 = vpop.f32.mrf.mxu1 }
 0x1d8   : > { %7079 = vst [vmem:[#allocation39_spill] sm:$0xff] %v6794_v3  ;;  %7080 = vst [vmem:[#allocation40_spill] sm:$0xff] %v6796_v61  ;;  %v2991_v19 = vadd.f32 %v6690_v27, %v2620_v22 }
 0x1d9   : > { %v6799_v15 = vpop.f32.mrf.mxu0  ;;  %v6801_v38 = vpop.f32.mrf.mxu1 }
 0x1da   : > { %7081 = vst [vmem:[#allocation41_spill] sm:$0xff] %v6799_v15 }
 0x1db   : > { %v6804_v55 = vpop.f32.mrf.mxu0  ;;  %v6806_v41 = vpop.f32.mrf.mxu1 }
 0x1dc   : > { %7082 = vst [vmem:[#allocation42_spill] sm:$0xff] %v6804_v55  ;;  %v6820_v55 = vld [vmem:[%s6988_s3] ss:$0 sm:$0xff] }
 0x1dd   : > { %v6810_v3 = vpop.f32.mrf.mxu0  ;;  %v5213_v61 = vpop.f32.mrf.mxu1 }
 0x1de   : > { %7083 = vst [vmem:[#allocation43_spill] sm:$0xff] %v6810_v3  ;;  %v3359_v15 = vadd.f32 %v5213_v61, %v2989_v0  ;;  %v2990_v61 = vadd.f32 %v6694_v37, %v2619_v20  ;;  %v2624_v3 = vadd.f32 %v6704_v54, %v6609_v26 }
 0x1df   : > { %v5293_v44 = vpop.f32.mrf.mxu0  ;;  %v3199_v43 = vpop.f32.mrf.mxu1 }
 0x1e0   : > { %v3729_v57 = vadd.f32 %v5293_v44, %v3359_v15  ;;  %v3358_v32 = vadd.f32 %v3199_v43, %v2988_v18  ;;  %v2992_v18 = vadd.f32 %v6702_v29, %v2621_v23 }
 0x1e1   : > { %v3569_v14 = vpop.f32.mrf.mxu0  ;;  %v5216_v0 = vpop.f32.mrf.mxu1 }
 0x1e2   : > { %v3832_v39 = vadd.f32 %v6820_v55, %v3729_v57  ;;  %v3728_v11 = vadd.f32 %v3569_v14, %v3358_v32  ;;  %v3361_v24 = vadd.f32 %v5216_v0, %v2991_v19  ;;  %v2995_v19 = vadd.f32 %v6706_v36, %v2624_v3 }
 0x1e3   : > { %v5296_v42 = vpop.f32.mrf.mxu0  ;;  %v3209_v22 = vpop.f32.mrf.mxu1  ;;  %v2626_v57 = vadd.f32 %v6712_v53, %v6615_v56  ;;  %v2994_v0 = vadd.f32 %v6710_v48, %v2623_v12 }
 0x1e4   : > { %v3864_v15 = vmax.f32 %v3832_v39, 0.0  ;;  %v3831_v27 = vadd.f32 %v6820_v55, %v3728_v11  ;;  %v3731_v37 = vadd.f32 %v5296_v42, %v3361_v24  ;;  %v3360_v6 = vadd.f32 %v3209_v22, %v2990_v61 }
 0x1e5   : > { %v3579_v26 = vpop.f32.mrf.mxu0  ;;  %v5219_v54 = vpop.f32.mrf.mxu1  ;;  %v2625_v61 = vadd.f32 %v6716_v63, %v6618_v33  ;;  %v2997_v24 = vadd.f32 %v6714_v49, %v2626_v57 }
 0x1e6   : > { %3896 = vst [vmem:[%s6834_s21 + $0x8] sm:$0xff] %v3864_v15  ;;  %v3863_v20 = vmax.f32 %v3831_v27, 0.0  ;;  %v3834_v13 = vadd.f32 %v6820_v55, %v3731_v37  ;;  %v3730_v44 = vadd.f32 %v3579_v26, %v3360_v6  ;;  %v3363_v43 = vadd.f32 %v5219_v54, %v2993_v31 }
 0x1e7   : > { %v5299_v32 = vpop.f32.mrf.mxu0  ;;  %v3219_v14 = vpop.f32.mrf.mxu1  ;;  %v2628_v31 = vadd.f32 %v6720_v17, %v6621_v34  ;;  %v2996_v27 = vadd.f32 %v6718_v16, %v2625_v61  ;;  %v2627_v37 = vadd.f32 %v6724_v1, %v6624_v30  ;;  %v2630_v54 = vadd.f32 %v6728_v25, %v6627_v28 }
 0x1e8   : > { %3895 = vst [vmem:[%s6834_s21] sm:$0xff] %v3863_v20  ;;  %v3866_v29 = vmax.f32 %v3834_v13, 0.0  ;;  %v3833_v2 = vadd.f32 %v6820_v55, %v3730_v44  ;;  %v3733_v45 = vadd.f32 %v5299_v32, %v3363_v43  ;;  %v3362_v23 = vadd.f32 %v3219_v14, %v2992_v18 }
 0x1e9   : > { %v3589_v39 = vpop.f32.mrf.mxu0  ;;  %v5222_v11 = vpop.f32.mrf.mxu1  ;;  %v2999_v26 = vadd.f32 %v6722_v52, %v2628_v31  ;;  %v2998_v43 = vadd.f32 %v6726_v51, %v2627_v37  ;;  %v7084_v37 = vld [vmem:[#allocation4_spill] sm:$0xff] }
 0x1ea   : > { %3898 = vst [vmem:[%s6834_s21 + $0x18] sm:$0xff] %v3866_v29  ;;  %v3865_v3 = vmax.f32 %v3833_v2, 0.0  ;;  %v3836_v56 = vadd.f32 %v6820_v55, %v3733_v45  ;;  %v3732_v36 = vadd.f32 %v3589_v39, %v3362_v23  ;;  %v3365_v53 = vadd.f32 %v5222_v11, %v2995_v19 }
 0x1eb   : > { %v5302_v42 = vpop.f32.mrf.mxu0  ;;  %v3229_v22 = vpop.f32.mrf.mxu1  ;;  %v2629_v19 = vadd.f32 %v6732_v58, %v6630_v21  ;;  %v3001_v29 = vadd.f32 %v6730_v7, %v2630_v54  ;;  %v2632_v2 = vadd.f32 %v6736_v10, %v6633_v5  ;;  %v2631_v39 = vadd.f32 %v6740_v4, %v6636_v47  ;;  %v7087_v54 = vld [vmem:[#allocation5_spill] sm:$0xff] }
 0x1ec   : > { %3897 = vst [vmem:[%s6834_s21 + $0x10] sm:$0xff] %v3865_v3  ;;  %v3868_v48 = vmax.f32 %v3836_v56, 0.0  ;;  %v3835_v33 = vadd.f32 %v6820_v55, %v3732_v36  ;;  %v3735_v63 = vadd.f32 %v5302_v42, %v3365_v53  ;;  %v3364_v15 = vadd.f32 %v3229_v22, %v2994_v0 }
 0x1ed   : > { %v3599_v6 = vpop.f32.mrf.mxu0  ;;  %v5225_v18 = vpop.f32.mrf.mxu1  ;;  %v3000_v61 = vadd.f32 %v6734_v60, %v2629_v19  ;;  %v3003_v36 = vadd.f32 %v6738_v46, %v2632_v2  ;;  %v2634_v53 = vadd.f32 %v6744_v8, %v6639_v35  ;;  %v3002_v22 = vadd.f32 %v6742_v40, %v2631_v39  ;;  %v7089_v19 = vld [vmem:[#allocation20_spill] sm:$0xff] }
 0x1ee   : > { %3900 = vst [vmem:[%s6834_s21 + $0x28] sm:$0xff] %v3868_v48  ;;  %v3867_v49 = vmax.f32 %v3835_v33, 0.0  ;;  %v3838_v34 = vadd.f32 %v6820_v55, %v3735_v63  ;;  %v3734_v17 = vadd.f32 %v3599_v6, %v3364_v15  ;;  %v3367_v12 = vadd.f32 %v5225_v18, %v2997_v24  ;;  %v7085_v6 = vld [vmem:[#allocation19_spill] sm:$0xff] }
 0x1ef   : > { %v5305_v20 = vpop.f32.mrf.mxu0  ;;  %v3239_v13 = vpop.f32.mrf.mxu1  ;;  %v2633_v48 = vadd.f32 %v6748_v62, %v6642_v50  ;;  %v2636_v18 = vadd.f32 %v7085_v6, %v7084_v37 }
 0x1f0   : > { %3899 = vst [vmem:[%s6834_s21 + $0x20] sm:$0xff] %v3867_v49  ;;  %v3870_v16 = vmax.f32 %v3838_v34, 0.0  ;;  %v3837_v30 = vadd.f32 %v6820_v55, %v3734_v17  ;;  %v3737_v1 = vadd.f32 %v5305_v20, %v3367_v12  ;;  %v3366_v44 = vadd.f32 %v3239_v13, %v2996_v27  ;;  %v7086_v12 = vld [vmem:[#allocation18_spill] sm:$0xff]  ;;  %v7088_v20 = vld [vmem:[#allocation21_spill] sm:$0xff] }
 0x1f1   : > { %v3609_v57 = vpop.f32.mrf.mxu0  ;;  %v5228_v32 = vpop.f32.mrf.mxu1  ;;  %v3005_v27 = vadd.f32 %v6746_v9, %v2634_v53  ;;  %v2635_v13 = vadd.f32 %v7088_v20, %v7087_v54  ;;  %v7096_v53 = vld [vmem:[#allocation8_spill] sm:$0xff] }
 0x1f2   : > { %3902 = vst [vmem:[%s6834_s21 + $0x38] sm:$0xff] %v3870_v16  ;;  %v3869_v52 = vmax.f32 %v3837_v30, 0.0  ;;  %v3840_v28 = vadd.f32 %v6820_v55, %v3737_v1  ;;  %v3736_v25 = vadd.f32 %v3609_v57, %v3366_v44  ;;  %v3369_v14 = vadd.f32 %v5228_v32, %v2999_v26  ;;  %v7090_v32 = vld [vmem:[#allocation6_spill] sm:$0xff] }
 0x1f3   : > { %v5308_v45 = vpop.f32.mrf.mxu0  ;;  %v3249_v23 = vpop.f32.mrf.mxu1  ;;  %v3004_v26 = vadd.f32 %v7086_v12, %v2633_v48  ;;  %v3007_v57 = vadd.f32 %v7089_v19, %v2636_v18 }
 0x1f4   : > { %3901 = vst [vmem:[%s6834_s21 + $0x30] sm:$0xff] %v3869_v52  ;;  %v3872_v51 = vmax.f32 %v3840_v28, 0.0  ;;  %v3839_v21 = vadd.f32 %v6820_v55, %v3736_v25  ;;  %v3739_v58 = vadd.f32 %v5308_v45, %v3369_v14  ;;  %v3368_v0 = vadd.f32 %v3249_v23, %v2998_v43  ;;  %v7091_v52 = vld [vmem:[#allocation23_spill] sm:$0xff] }
 0x1f5   : > { %v3619_v11 = vpop.f32.mrf.mxu0  ;;  %v5231_v3 = vpop.f32.mrf.mxu1  ;;  %v2638_v28 = vadd.f32 %v7091_v52, %v7090_v32 }
 0x1f6   : > { %3904 = vst [vmem:[%s6834_s21 + $0x48] sm:$0xff] %v3872_v51  ;;  %v3871_v7 = vmax.f32 %v3839_v21, 0.0  ;;  %v3842_v5 = vadd.f32 %v6820_v55, %v3739_v58  ;;  %v3738_v10 = vadd.f32 %v3619_v11, %v3368_v0  ;;  %v3371_v56 = vadd.f32 %v5231_v3, %v3001_v29  ;;  %v7092_v51 = vld [vmem:[#allocation22_spill] sm:$0xff]  ;;  %v7093_v58 = vld [vmem:[#allocation7_spill] sm:$0xff]  ;;  %v7094_v0 = vld [vmem:[#allocation25_spill] sm:$0xff] }
 0x1f7   : > { %v5311_v24 = vpop.f32.mrf.mxu0  ;;  %v3259_v31 = vpop.f32.mrf.mxu1  ;;  %v3006_v21 = vadd.f32 %v7092_v51, %v2635_v13 }
 0x1f8   : > { %3903 = vst [vmem:[%s6834_s21 + $0x40] sm:$0xff] %v3871_v7  ;;  %v3874_v60 = vmax.f32 %v3842_v5, 0.0  ;;  %v3841_v47 = vadd.f32 %v6820_v55, %v3738_v10  ;;  %v3741_v4 = vadd.f32 %v5311_v24, %v3371_v56  ;;  %v3370_v42 = vadd.f32 %v3259_v31, %v3000_v61  ;;  %v7095_v56 = vld [vmem:[#allocation24_spill] sm:$0xff]  ;;  %v7097_v24 = vld [vmem:[#allocation27_spill] sm:$0xff] }
 0x1f9   : > { %v3629_v33 = vpop.f32.mrf.mxu0  ;;  %v5234_v63 = vpop.f32.mrf.mxu1  ;;  %v2637_v61 = vadd.f32 %v7094_v0, %v7093_v58  ;;  %v2640_v31 = vadd.f32 %v7097_v24, %v7096_v53 }
 0x1fa   : > { %3906 = vst [vmem:[%s6834_s21 + $0x58] sm:$0xff] %v3874_v60  ;;  %v3873_v46 = vmax.f32 %v3841_v47, 0.0  ;;  %v3844_v35 = vadd.f32 %v6820_v55, %v3741_v4  ;;  %v3740_v8 = vadd.f32 %v3629_v33, %v3370_v42  ;;  %v3373_v15 = vadd.f32 %v5234_v63, %v3003_v36  ;;  %v7098_v33 = vld [vmem:[#allocation26_spill] sm:$0xff] }
 0x1fb   : > { %v5314_v49 = vpop.f32.mrf.mxu0  ;;  %v3269_v34 = vpop.f32.mrf.mxu1  ;;  %v3009_v36 = vadd.f32 %v7095_v56, %v2638_v28  ;;  %v3008_v63 = vadd.f32 %v7098_v33, %v2637_v61 }
 0x1fc   : > { %3905 = vst [vmem:[%s6834_s21 + $0x50] sm:$0xff] %v3873_v46  ;;  %v3876_v40 = vmax.f32 %v3844_v35, 0.0  ;;  %v3843_v50 = vadd.f32 %v6820_v55, %v3740_v8  ;;  %v3743_v62 = vadd.f32 %v5314_v49, %v3373_v15  ;;  %v3372_v17 = vadd.f32 %v3269_v34, %v3002_v22  ;;  %v7099_v46 = vld [vmem:[#allocation9_spill] sm:$0xff]  ;;  %v7101_v34 = vld [vmem:[#allocation28_spill] sm:$0xff] }
 0x1fd   : > { %v3639_v16 = vpop.f32.mrf.mxu0  ;;  %v5237_v30 = vpop.f32.mrf.mxu1  ;;  %v7100_v35 = vld [vmem:[#allocation29_spill] sm:$0xff] }
 0x1fe   : > { %3908 = vst [vmem:[%s6834_s21 + $0x68] sm:$0xff] %v3876_v40  ;;  %v3875_v9 = vmax.f32 %v3843_v50, 0.0  ;;  %v3846_v1 = vadd.f32 %v6820_v55, %v3743_v62  ;;  %v3742_v44 = vadd.f32 %v3639_v16, %v3372_v17  ;;  %v3375_v43 = vadd.f32 %v5237_v30, %v3005_v27  ;;  %v7102_v50 = vld [vmem:[#allocation10_spill] sm:$0xff]  ;;  %v7103_v62 = vld [vmem:[#allocation31_spill] sm:$0xff] }
 0x1ff   : > { %v5317_v25 = vpop.f32.mrf.mxu0  ;;  %v3279_v14 = vpop.f32.mrf.mxu1  ;;  %v2639_v8 = vadd.f32 %v7100_v35, %v7099_v46  ;;  %v3011_v40 = vadd.f32 %v7101_v34, %v2640_v31  ;;  %v2642_v17 = vadd.f32 %v7103_v62, %v7102_v50  ;;  %v7104_v30 = vld [vmem:[#allocation30_spill] sm:$0xff]  ;;  %v7112_v31 = vld [vmem:[#allocation35_spill] sm:$0xff] }
 0x200   : > { %3907 = vst [vmem:[%s6834_s21 + $0x60] sm:$0xff] %v3875_v9  ;;  %v3878_v29 = vmax.f32 %v3846_v1, 0.0  ;;  %v3845_v2 = vadd.f32 %v6820_v55, %v3742_v44  ;;  %v3745_v45 = vadd.f32 %v5317_v25, %v3375_v43  ;;  %v3374_v23 = vadd.f32 %v3279_v14, %v3004_v26  ;;  %v7105_v1 = vld [vmem:[#allocation11_spill] sm:$0xff]  ;;  %v7106_v44 = vld [vmem:[#allocation33_spill] sm:$0xff]  ;;  %v7107_v14 = vld [vmem:[#allocation32_spill] sm:$0xff] }
 0x201   : > { %v3649_v39 = vpop.f32.mrf.mxu0  ;;  %v5240_v11 = vpop.f32.mrf.mxu1  ;;  %v3010_v9 = vadd.f32 %v7104_v30, %v2639_v8  ;;  %v2641_v43 = vadd.f32 %v7106_v44, %v7105_v1  ;;  %v7115_v8 = vld [vmem:[#allocation37_spill] sm:$0xff] }
 0x202   : > { %3910 = vst [vmem:[%s6834_s21 + $0x78] sm:$0xff] %v3878_v29  ;;  %v3877_v3 = vmax.f32 %v3845_v2, 0.0  ;;  %v3848_v7 = vadd.f32 %v6820_v55, %v3745_v45  ;;  %v3744_v5 = vadd.f32 %v3649_v39, %v3374_v23  ;;  %v3377_v10 = vadd.f32 %v5240_v11, %v3007_v57  ;;  %v7108_v2 = vld [vmem:[#allocation12_spill] sm:$0xff]  ;;  %v7109_v39 = vld [vmem:[#allocation34_spill] sm:$0xff]  ;;  %v7120_v44 = vld [vmem:[#allocation41_spill] sm:$0xff] }
 0x203   : > { %v5320_v60 = vpop.f32.mrf.mxu0  ;;  %v3289_v47 = vpop.f32.mrf.mxu1  ;;  %v3013_v29 = vadd.f32 %v7107_v14, %v2642_v17  ;;  %v2644_v45 = vadd.f32 %v6784_v59, %v7108_v2  ;;  %v3012_v11 = vadd.f32 %v7109_v39, %v2641_v43  ;;  %v7118_v17 = vld [vmem:[#allocation39_spill] sm:$0xff] }
 0x204   : > { %3909 = vst [vmem:[%s6834_s21 + $0x70] sm:$0xff] %v3877_v3  ;;  %v3880_v4 = vmax.f32 %v3848_v7, 0.0  ;;  %v3847_v42 = vadd.f32 %v6820_v55, %v3744_v5  ;;  %v3747_v22 = vadd.f32 %v5320_v60, %v3377_v10  ;;  %v3376_v48 = vadd.f32 %v3289_v47, %v3006_v21  ;;  %v7110_v3 = vld [vmem:[#allocation13_spill] sm:$0xff]  ;;  %v7111_v7 = vld [vmem:[#allocation36_spill] sm:$0xff]  ;;  %v7113_v47 = vld [vmem:[#allocation14_spill] sm:$0xff] }
 0x205   : > { %v3659_v15 = vpop.f32.mrf.mxu0  ;;  %v5243_v27 = vpop.f32.mrf.mxu1  ;;  %v2643_v5 = vadd.f32 %v7111_v7, %v7110_v3  ;;  %v3015_v60 = vadd.f32 %v7112_v31, %v2644_v45 }
 0x206   : > { %3912 = vst [vmem:[%s6834_s21 + $0x88] sm:$0xff] %v3880_v4  ;;  %v3879_v37 = vmax.f32 %v3847_v42, 0.0  ;;  %v3850_v6 = vadd.f32 %v6820_v55, %v3747_v22  ;;  %v3746_v18 = vadd.f32 %v3659_v15, %v3376_v48  ;;  %v3379_v49 = vadd.f32 %v5243_v27, %v3009_v36  ;;  %v7114_v4 = vld [vmem:[#allocation38_spill] sm:$0xff]  ;;  %v7116_v27 = vld [vmem:[#allocation15_spill] sm:$0xff] }
 0x207   : > { %v5323_v12 = vpop.f32.mrf.mxu0  ;;  %v3299_v26 = vpop.f32.mrf.mxu1  ;;  %v2646_v42 = vadd.f32 %v7114_v4, %v7113_v47  ;;  %v3014_v15 = vadd.f32 %v7115_v8, %v2643_v5 }
 0x208   : > { %3911 = vst [vmem:[%s6834_s21 + $0x80] sm:$0xff] %v3879_v37  ;;  %v3882_v54 = vmax.f32 %v3850_v6, 0.0  ;;  %v3849_v20 = vadd.f32 %v6820_v55, %v3746_v18  ;;  %v3749_v13 = vadd.f32 %v5323_v12, %v3379_v49  ;;  %v3378_v16 = vadd.f32 %v3299_v26, %v3008_v63  ;;  %v7117_v37 = vld [vmem:[#allocation40_spill] sm:$0xff] }
 0x209   : > { %v3669_v19 = vpop.f32.mrf.mxu0  ;;  %v5246_v57 = vpop.f32.mrf.mxu1  ;;  %v2645_v6 = vadd.f32 %v7117_v37, %v7116_v27  ;;  %v3017_v12 = vadd.f32 %v7118_v17, %v2646_v42  ;;  %v7119_v26 = vld [vmem:[#allocation16_spill] sm:$0xff] }
 0x20a   : > { %3914 = vst [vmem:[%s6834_s21 + $0x98] sm:$0xff] %v3882_v54  ;;  %v3881_v32 = vmax.f32 %v3849_v20, 0.0  ;;  %v3852_v52 = vadd.f32 %v6820_v55, %v3749_v13  ;;  %v3748_v28 = vadd.f32 %v3669_v19, %v3378_v16  ;;  %v3381_v25 = vadd.f32 %v5246_v57, %v3011_v40  ;;  %v7121_v19 = vld [vmem:[#allocation17_spill] sm:$0xff] }
 0x20b   : > { %v5326_v23 = vpop.f32.mrf.mxu0  ;;  %v3309_v51 = vpop.f32.mrf.mxu1  ;;  %v2648_v54 = vadd.f32 %v6801_v38, %v7119_v26  ;;  %v3016_v43 = vadd.f32 %v7120_v44, %v2645_v6  ;;  %v2647_v57 = vadd.f32 %v6806_v41, %v7121_v19 }
 0x20c   : > { %3913 = vst [vmem:[%s6834_s21 + $0x90] sm:$0xff] %v3881_v32  ;;  %v3884_v21 = vmax.f32 %v3852_v52, 0.0  ;;  %v3851_v58 = vadd.f32 %v6820_v55, %v3748_v28  ;;  %v3751_v0 = vadd.f32 %v5326_v23, %v3381_v25  ;;  %v3380_v61 = vadd.f32 %v3309_v51, %v3010_v9 }
 0x20d   : > { %v3679_v10 = vpop.f32.mrf.mxu0  ;;  %v5249_v56 = vpop.f32.mrf.mxu1 }
 0x20e   : > { %3916 = vst [vmem:[%s6834_s21 + $0xa8] sm:$0xff] %v3884_v21  ;;  %v3883_v36 = vmax.f32 %v3851_v58, 0.0  ;;  %v3854_v59 = vadd.f32 %v6820_v55, %v3751_v0  ;;  %v3750_v53 = vadd.f32 %v3679_v10, %v3380_v61  ;;  %v3383_v24 = vadd.f32 %v5249_v56, %v3013_v29  ;;  %v7122_v29 = vld [vmem:[#allocation42_spill] sm:$0xff]  ;;  %v7123_v0 = vld [vmem:[#allocation43_spill] sm:$0xff] }
 0x20f   : > { %v5329_v22 = vpop.f32.mrf.mxu0  ;;  %v3319_v48 = vpop.f32.mrf.mxu1  ;;  %v3019_v2 = vadd.f32 %v7122_v29, %v2648_v54  ;;  %v3018_v61 = vadd.f32 %v7123_v0, %v2647_v57 }
 0x210   : > { %3915 = vst [vmem:[%s6834_s21 + $0xa0] sm:$0xff] %v3883_v36  ;;  %v3886_v33 = vmax.f32 %v3854_v59, 0.0  ;;  %v3853_v63 = vadd.f32 %v6820_v55, %v3750_v53  ;;  %v3753_v46 = vadd.f32 %v5329_v22, %v3383_v24  ;;  %v3382_v35 = vadd.f32 %v3319_v48, %v3012_v11 }
 0x211   : > { %v3689_v18 = vpop.f32.mrf.mxu0  ;;  %v5252_v49 = vpop.f32.mrf.mxu1 }
 0x212   : > { %3918 = vst [vmem:[%s6834_s21 + $0xb8] sm:$0xff] %v3886_v33  ;;  %v3885_v34 = vmax.f32 %v3853_v63, 0.0  ;;  %v3856_v40 = vadd.f32 %v6820_v55, %v3753_v46  ;;  %v3752_v50 = vadd.f32 %v3689_v18, %v3382_v35  ;;  %v3385_v62 = vadd.f32 %v5252_v49, %v3015_v60 }
 0x213   : > { %v5332_v20 = vpop.f32.mrf.mxu0  ;;  %v3329_v13 = vpop.f32.mrf.mxu1 }
 0x214   : > { %3917 = vst [vmem:[%s6834_s21 + $0xb0] sm:$0xff] %v3885_v34  ;;  %v3888_v16 = vmax.f32 %v3856_v40, 0.0  ;;  %v3855_v30 = vadd.f32 %v6820_v55, %v3752_v50  ;;  %v3755_v9 = vadd.f32 %v5332_v20, %v3385_v62  ;;  %v3384_v1 = vadd.f32 %v3329_v13, %v3014_v15 }
 0x215   : > { %v3699_v32 = vpop.f32.mrf.mxu0  ;;  %v5255_v52 = vpop.f32.mrf.mxu1 }
 0x216   : > { %3920 = vst [vmem:[%s6834_s21 + $0xc8] sm:$0xff] %v3888_v16  ;;  %v3887_v28 = vmax.f32 %v3855_v30, 0.0  ;;  %v3858_v38 = vadd.f32 %v6820_v55, %v3755_v9  ;;  %v3754_v25 = vadd.f32 %v3699_v32, %v3384_v1  ;;  %v3387_v14 = vadd.f32 %v5255_v52, %v3017_v12 }
 0x217   : > { %v5335_v45 = vpop.f32.mrf.mxu0  ;;  %v3339_v23 = vpop.f32.mrf.mxu1 }
 0x218   : > { %3919 = vst [vmem:[%s6834_s21 + $0xc0] sm:$0xff] %v3887_v28  ;;  %v3890_v51 = vmax.f32 %v3858_v38, 0.0  ;;  %v3857_v21 = vadd.f32 %v6820_v55, %v3754_v25  ;;  %v3757_v58 = vadd.f32 %v5335_v45, %v3387_v14  ;;  %v3386_v41 = vadd.f32 %v3339_v23, %v3016_v43 }
 0x219   : > { %v3709_v39 = vpop.f32.mrf.mxu0  ;;  %v5258_v11 = vpop.f32.mrf.mxu1 }
 0x21a   : > { %3922 = vst [vmem:[%s6834_s21 + $0xd8] sm:$0xff] %v3890_v51  ;;  %v3889_v3 = vmax.f32 %v3857_v21, 0.0  ;;  %v3860_v7 = vadd.f32 %v6820_v55, %v3757_v58  ;;  %v3756_v5 = vadd.f32 %v3709_v39, %v3386_v41  ;;  %v3389_v10 = vadd.f32 %v5258_v11, %v3019_v2 }
 0x21b   : > { %v5338_v56 = vpop.f32.mrf.mxu0  ;;  %v3349_v36 = vpop.f32.mrf.mxu1 }
 0x21c   : > { %3921 = vst [vmem:[%s6834_s21 + $0xd0] sm:$0xff] %v3889_v3  ;;  %v3892_v59 = vmax.f32 %v3860_v7, 0.0  ;;  %v3859_v53 = vadd.f32 %v6820_v55, %v3756_v5  ;;  %v3759_v24 = vadd.f32 %v5338_v56, %v3389_v10  ;;  %v3388_v31 = vadd.f32 %v3349_v36, %v3018_v61 }
 0x21d   : > { %v3719_v60 = vpop.f32.mrf.mxu0 }
 0x21e   : > { %3924 = vst [vmem:[%s6834_s21 + $0xe8] sm:$0xff] %v3892_v59  ;;  %v3891_v47 = vmax.f32 %v3859_v53, 0.0  ;;  %v3862_v4 = vadd.f32 %v6820_v55, %v3759_v24  ;;  %v3758_v42 = vadd.f32 %v3719_v60, %v3388_v31 }
 0x220   : > { %3923 = vst [vmem:[%s6834_s21 + $0xe0] sm:$0xff] %v3891_v47  ;;  %v3894_v22 = vmax.f32 %v3862_v4, 0.0  ;;  %v3861_v48 = vadd.f32 %v6820_v55, %v3758_v42 }
 0x222   : > { %3926 = vst [vmem:[%s6834_s21 + $0xf8] sm:$0xff] %v3894_v22  ;;  %v3893_v33 = vmax.f32 %v3861_v48, 0.0 }
 0x224   : > { %3925 = vst [vmem:[%s6834_s21 + $0xf0] sm:$0xff] %v3893_v33 }
 0x225 PF: > { %s14_s17 = sadd.s32 1, %s5428_s17   ;;  %s7124_s15 = smov %s5424_s16 }
 0x226   : > { %p11_p5 = scmp.ge.s32.totalorder %s14_s17, 4   ;;  %s7125_s16 = smov %s7127_s18 }
 0x228   :  { %13 = sbr.rel (!%p11_p5) target bundleno = 2 (0x2), region = 80 }

</bundles_post_ra>
